<compile_context>
chip_gen: v7x
topology: tpu7x:2x2x1
jax: 0.10.0
libtpu: 0.0.40
codegen_flags: <defaults>
</compile_context>

<pallas_src>
import jax
import jax.numpy as jnp
from jax.experimental import pallas as pl
from jax.experimental.pallas import tpu as pltpu

# ----------------------- small config (consistent with the module) ------------
VOCAB = 256
HIDDEN = 128                 # cfg['hidden_size']
VISION_HIDDEN = 64           # cfg['vision_hidden_size']
DV_PAD = 128                 # vision_hidden padded to a lane multiple
PATCH = 8
IMG_C, IMG_H, IMG_W = 3, 16, 16
PATCH_K = IMG_C * PATCH * PATCH          # 192
PATCH_K_PAD = 256                        # padded to a lane multiple
NUM_PATCHES = (IMG_H // PATCH) * (IMG_W // PATCH)   # 4
SEQ_LEN = 16
IMAGE_ID = 250
ASSISTANT_ID = 251
PAD_TOKEN_ID = 255
IGNORE_INDEX = -100
# connector_type = "mlp2x_gelu"  -> Linear(Dv, H), GELU, Linear(H, H)

_INV_SQRT2 = 0.7071067811865476


def _full_spec(shape):
    """Whole-array block (block_shape == array shape satisfies the (8,128) rule)."""
    return pl.BlockSpec(shape, lambda i: (0,) * len(shape))


# ------------------------------- fused Pallas kernel ---------------------------

def _fused_forward_kernel(patches_ref, ids_ref, slots_ref, tgt_ref,
                          pw_ref, pb_ref, w1_ref, b1_ref, w2_ref, b2_ref,
                          embed_ref, lmw_ref, lmb_ref, out_ref):
    f32 = jnp.float32

    # ---- vision tower stand-in (patch embedding) + connector (mlp2x_gelu) ----
    # TODO(synk): SiglipVisionModel(...).hidden_states[-2] (full ViT stack) has
    # no clean Pallas equivalent here; replaced by a deterministic patch
    # embedding (conv-as-matmul) fused with the real connector.
    v = jnp.dot(patches_ref[...], pw_ref[...], preferred_element_type=f32) + pb_ref[...]
    h = jnp.dot(v, w1_ref[...], preferred_element_type=f32) + b1_ref[...]
    # exact (erf) GELU, matching PyTorch's default nn.GELU
    h = 0.5 * h * (1.0 + jax.lax.erf(h * _INV_SQRT2))
    proj = jnp.dot(h, w2_ref[...], preferred_element_type=f32) + b2_ref[...]   # [b*Np, H]

    # ---- per-row metadata (built in the wrapper, tiny i32 arrays) -------------
    ids = ids_ref[...]        # [R,1] spliced token id (0 on image/pad rows)
    slots = slots_ref[...]    # [R,1] projector row index, or -1 for text/pad rows
    tgt = tgt_ref[...]        # [R,1] shifted label, IGNORE_INDEX (-100) = masked

    R = ids.shape[0]
    vocab_col = jax.lax.broadcasted_iota(jnp.int32, (R, VOCAB), 1)

    # Token-embedding lookup as a one-hot matmul on the VMEM-resident table.
    onehot_txt = jnp.where((vocab_col == ids) & (slots < 0), 1.0, 0.0)
    emb = jnp.dot(onehot_txt, embed_ref[...], preferred_element_type=f32)      # [R, H]

    # <image> splice: scatter the projector rows into their positions via a
    # second (tiny) one-hot matmul against the in-register proj rows.
    slot_col = jax.lax.broadcasted_iota(jnp.int32, (R, proj.shape[0]), 1)
    onehot_img = jnp.where(slot_col == slots, 1.0, 0.0)
    emb = emb + jnp.dot(onehot_img, proj, preferred_element_type=f32)          # [R, H]

    # ---- lm_head + HF-style shifted masked cross-entropy ----------------------
    # TODO(synk): full Qwen2 transformer stack not reproduced; the LM stand-in
    # is the lm_head projection + shifted masked cross-entropy.
    logits = jnp.dot(emb, lmw_ref[...], preferred_element_type=f32) + lmb_ref[...]   # [R, V]
    m = jnp.max(logits, axis=-1, keepdims=True)
    lse = jnp.log(jnp.sum(jnp.exp(logits - m), axis=-1, keepdims=True)) + m
    gold = jnp.sum(jnp.where(vocab_col == tgt, logits, 0.0), axis=-1, keepdims=True)
    valid = (tgt != IGNORE_INDEX).astype(f32)          # also masks padded tail rows
    nll = jnp.sum((lse - gold) * valid)
    cnt = jnp.sum(valid)
    loss = nll / jnp.maximum(cnt, 1.0)

    # Lane-dense (1,128) output row: [loss, nll, cnt, 0, ...]
    lane = jax.lax.broadcasted_iota(jnp.int32, (1, 128), 1)
    out_ref[...] = jnp.where(lane == 0, loss,
                             jnp.where(lane == 1, nll,
                                       jnp.where(lane == 2, cnt, 0.0)))


def fused_forward(patches, ids, slots, targets, params):
    """One pallas_call for vision+connector+embed+splice+lm_head+CE."""
    return pl.pallas_call(
        _fused_forward_kernel,
        out_shape=jax.ShapeDtypeStruct((1, 128), jnp.float32),
        grid=(1,),
        in_specs=[_full_spec(patches.shape),
                  _full_spec(ids.shape), _full_spec(slots.shape), _full_spec(targets.shape),
                  _full_spec(params['patch_w'].shape), _full_spec(params['patch_b'].shape),
                  _full_spec(params['conn_w1'].shape), _full_spec(params['conn_b1'].shape),
                  _full_spec(params['conn_w2'].shape), _full_spec(params['conn_b2'].shape),
                  _full_spec(params['embed_tokens'].shape),
                  _full_spec(params['lm_head_w'].shape), _full_spec(params['lm_head_b'].shape)],
        out_specs=_full_spec((1, 128)),
        compiler_params=pltpu.CompilerParams(dimension_semantics=("arbitrary",)),
    )(patches, ids, slots, targets,
      params['patch_w'], params['patch_b'],
      params['conn_w1'], params['conn_b1'],
      params['conn_w2'], params['conn_b2'],
      params['embed_tokens'], params['lm_head_w'], params['lm_head_b'])


# ------------------------------- model pieces ----------------------------------

def patchify_nchw(img, p):
    """img: [C, H, W] -> [num_patches, PATCH_K_PAD] (Conv2d(k=p, stride=p) unfold,
    zero-padded along K so the MXU operand is lane-dense)."""
    C, H, W = img.shape
    x = img.reshape(C, H // p, p, W // p, p)
    x = jnp.transpose(x, (1, 3, 0, 2, 4))            # [H/p, W/p, C, p, p]
    x = x.reshape((H // p) * (W // p), C * p * p)
    return jnp.pad(x, ((0, 0), (0, PATCH_K_PAD - C * p * p)))


def mini_llava_forward(params, text, image):
    """text: [b, seq] int32, image: [b, C, H, W] f32 -> scalar LM loss.

    Fully traceable / jittable.  T = seq_len - 1 + num_patches is static; only
    the splice position (location of <image>) varies.  All heavy work runs in
    ONE fused Pallas kernel; the wrapper only does tiny integer bookkeeping on
    [b, T] arrays.
    """
    b, seq_len = text.shape
    Np = NUM_PATCHES
    T = seq_len - 1 + Np
    R = b * T
    R_pad = ((R + 7) // 8) * 8

    # ---- patch extraction (pure reshape/transpose, tiny) ----------------------
    patches = jax.vmap(lambda im: patchify_nchw(im, PATCH))(image)    # [b, Np, 256]
    patches = patches.reshape(b * Np, PATCH_K_PAD)                    # M = b*Np (8)

    # ---- special-token positions ----------------------------------------------
    # NOTE: like the PyTorch module, assumes <image> and ASSISTANT are present
    # (argmax silently returns 0 if not; the original would raise instead).
    image_ind = jnp.argmax(text == IMAGE_ID, axis=1).astype(jnp.int32)         # [b]
    assistant_ind = jnp.argmax(text == ASSISTANT_ID, axis=1).astype(jnp.int32) # [b]
    pos = jnp.arange(T, dtype=jnp.int32)                                       # [T]

    def meta_one(text_i, img_i, asst_i, batch_i):
        # spliced position j:  j < img_i             -> text token j
        #                      img_i <= j < img_i+Np -> projector row j - img_i
        #                      j >= img_i+Np         -> text token j - Np + 1
        in_img = (pos >= img_i) & (pos < img_i + Np)
        txt_idx = jnp.clip(jnp.where(pos < img_i, pos, pos - Np + 1), 0, seq_len - 1)
        tok = text_i[txt_idx]
        ids = jnp.where(in_img, 0, tok).astype(jnp.int32)
        slot = jnp.where(in_img, batch_i * Np + (pos - img_i), -1).astype(jnp.int32)
        # labels: [-100]*pre followed by text[assistant_ind+2:]  (pre+tail == T,
        # so the pad_token branch of the original is never reached; out-of-range
        # positions here get IGNORE_INDEX which keeps them out of the loss).
        pre = asst_i + 1 + 1 - 1 + Np
        lab = jnp.where(pos >= pre, tok, IGNORE_INDEX).astype(jnp.int32)
        return ids, slot, lab

    ids, slots, labels = jax.vmap(meta_one)(
        text, image_ind, assistant_ind, jnp.arange(b, dtype=jnp.int32))        # [b, T]

    # HF CausalLM shift: position j is scored against label j+1.
    targets = jnp.concatenate(
        [labels[:, 1:], jnp.full((b, 1), IGNORE_INDEX, jnp.int32)], axis=1)    # [b, T]

    pad = R_pad - R
    ids = jnp.pad(ids.reshape(R), (0, pad)).reshape(R_pad, 1)
    slots = jnp.pad(slots.reshape(R), (0, pad), constant_values=-1).reshape(R_pad, 1)
    targets = jnp.pad(targets.reshape(R), (0, pad),
                      constant_values=IGNORE_INDEX).reshape(R_pad, 1)

    out = fused_forward(patches, ids, slots, targets, params)                  # [1, 128]
    return out[0, 0]


# ------------------------------- params ----------------------------------------

def init_params(key):
    ks = jax.random.split(key, 6)
    # patch embedding (vision stand-in), padded to lane-dense shapes:
    #   real block [PATCH_K=192, VISION_HIDDEN=64]; padding rows/cols are zero so
    #   the padded GEMMs are numerically identical to the unpadded ones.
    patch_w = jnp.zeros((PATCH_K_PAD, DV_PAD), jnp.float32)
    patch_w = patch_w.at[:PATCH_K, :VISION_HIDDEN].set(
        jax.random.normal(ks[1], (PATCH_K, VISION_HIDDEN), jnp.float32) * 0.02)
    patch_b = jnp.zeros((1, DV_PAD), jnp.float32)
    # connector: mlp2x_gelu -> Linear(Dv, H), GELU, Linear(H, H)
    conn_w1 = jnp.zeros((DV_PAD, HIDDEN), jnp.float32)
    conn_w1 = conn_w1.at[:VISION_HIDDEN, :].set(
        jax.random.normal(ks[2], (VISION_HIDDEN, HIDDEN), jnp.float32) * 0.02)
    return {
        'embed_tokens': jax.random.normal(ks[0], (VOCAB, HIDDEN), jnp.float32) * 0.02,
        'patch_w': patch_w,
        'patch_b': patch_b,
        'conn_w1': conn_w1,
        'conn_b1': jnp.zeros((1, HIDDEN), jnp.float32),
        'conn_w2': jax.random.normal(ks[3], (HIDDEN, HIDDEN), jnp.float32) * 0.02,
        'conn_b2': jnp.zeros((1, HIDDEN), jnp.float32),
        'lm_head_w': jax.random.normal(ks[4], (HIDDEN, VOCAB), jnp.float32) * 0.02,
        'lm_head_b': jnp.zeros((1, VOCAB), jnp.float32),
    }


# --------------------------------- main -----------------------------------------

if __name__ == "__main__":
    key = jax.random.PRNGKey(0)
    k_p, k_t, k_i = jax.random.split(key, 3)

    params = init_params(k_p)

    # text: [b, seq]; place <image> at position 3 and ASSISTANT at position 10.
    text = jax.random.randint(k_t, (2, SEQ_LEN), 0, 200, dtype=jnp.int32)
    text = text.at[:, 3].set(IMAGE_ID)
    text = text.at[:, 10].set(ASSISTANT_ID)

    # image: [b, C, H, W]  (NCHW, PyTorch convention)
    image = jax.random.normal(k_i, (2, IMG_C, IMG_H, IMG_W), jnp.float32)

    fwd = jax.jit(mini_llava_forward)
    loss = fwd(params, text, image)
    jax.block_until_ready(loss)
    assert bool(jnp.isfinite(loss))
    print("KERNEL_OK")
</pallas_src>

<mosaic_0001>
module attributes {stable_mosaic.version = 11 : i64} {
  func.func @_fused_forward_kernel(%arg0: i32, %arg1: memref<8x256xf32, #tpu.memory_space<vmem>>, %arg2: memref<40x1xi32, #tpu.memory_space<vmem>>, %arg3: memref<40x1xi32, #tpu.memory_space<vmem>>, %arg4: memref<40x1xi32, #tpu.memory_space<vmem>>, %arg5: memref<256x128xf32, #tpu.memory_space<vmem>>, %arg6: memref<1x128xf32, #tpu.memory_space<vmem>>, %arg7: memref<128x128xf32, #tpu.memory_space<vmem>>, %arg8: memref<1x128xf32, #tpu.memory_space<vmem>>, %arg9: memref<128x128xf32, #tpu.memory_space<vmem>>, %arg10: memref<1x128xf32, #tpu.memory_space<vmem>>, %arg11: memref<256x128xf32, #tpu.memory_space<vmem>>, %arg12: memref<128x256xf32, #tpu.memory_space<vmem>>, %arg13: memref<1x256xf32, #tpu.memory_space<vmem>>, %arg14: memref<1x128xf32, #tpu.memory_space<vmem>>) attributes {dimension_semantics = [#tpu.dimension_semantics<arbitrary>], iteration_bounds = array<i64: 1>, scalar_prefetch = 0 : i64, scratch_operands = 0 : i64, tpu.core_type = #tpu.core_type<tc>, window_params = [{pipeline_mode = #tpu.pipeline_mode<synchronous>, transform_indices = @transform_0, window_bounds = array<i64: 8, 256>}, {pipeline_mode = #tpu.pipeline_mode<synchronous>, transform_indices = @transform_1, window_bounds = array<i64: 40, 1>}, {pipeline_mode = #tpu.pipeline_mode<synchronous>, transform_indices = @transform_2, window_bounds = array<i64: 40, 1>}, {pipeline_mode = #tpu.pipeline_mode<synchronous>, transform_indices = @transform_3, window_bounds = array<i64: 40, 1>}, {pipeline_mode = #tpu.pipeline_mode<synchronous>, transform_indices = @transform_4, window_bounds = array<i64: 256, 128>}, {pipeline_mode = #tpu.pipeline_mode<synchronous>, transform_indices = @transform_5, window_bounds = array<i64: 1, 128>}, {pipeline_mode = #tpu.pipeline_mode<synchronous>, transform_indices = @transform_6, window_bounds = array<i64: 128, 128>}, {pipeline_mode = #tpu.pipeline_mode<synchronous>, transform_indices = @transform_7, window_bounds = array<i64: 1, 128>}, {pipeline_mode = #tpu.pipeline_mode<synchronous>, transform_indices = @transform_8, window_bounds = array<i64: 128, 128>}, {pipeline_mode = #tpu.pipeline_mode<synchronous>, transform_indices = @transform_9, window_bounds = array<i64: 1, 128>}, {pipeline_mode = #tpu.pipeline_mode<synchronous>, transform_indices = @transform_10, window_bounds = array<i64: 256, 128>}, {pipeline_mode = #tpu.pipeline_mode<synchronous>, transform_indices = @transform_11, window_bounds = array<i64: 128, 256>}, {pipeline_mode = #tpu.pipeline_mode<synchronous>, transform_indices = @transform_12, window_bounds = array<i64: 1, 256>}, {pipeline_mode = #tpu.pipeline_mode<synchronous>, transform_indices = @transform_13, window_bounds = array<i64: 1, 128>}]} {
    %c0 = arith.constant 0 : index
    %c0_0 = arith.constant 0 : index
    %0 = vector.load %arg1[%c0, %c0_0] : memref<8x256xf32, #tpu.memory_space<vmem>>, vector<8x256xf32>
    %c0_1 = arith.constant 0 : index
    %c0_2 = arith.constant 0 : index
    %1 = vector.load %arg5[%c0_1, %c0_2] : memref<256x128xf32, #tpu.memory_space<vmem>>, vector<256x128xf32>
    %cst = arith.constant dense<0.000000e+00> : vector<8x128xf32>
    %2 = tpu.matmul %0, %1, %cst {dimension_numbers = #tpu.dot_dimension_numbers<[1], [0], [0], [1], [0, 0, 1, 1], [], []>} : vector<8x256xf32>, vector<256x128xf32>, vector<8x128xf32> -> vector<8x128xf32>
    %c0_3 = arith.constant 0 : index
    %c0_4 = arith.constant 0 : index
    %3 = vector.load %arg6[%c0_3, %c0_4] : memref<1x128xf32, #tpu.memory_space<vmem>>, vector<1x128xf32>
    %4 = vector.broadcast %3 : vector<1x128xf32> to vector<8x128xf32>
    %5 = arith.addf %2, %4 : vector<8x128xf32>
    %c0_5 = arith.constant 0 : index
    %c0_6 = arith.constant 0 : index
    %6 = vector.load %arg7[%c0_5, %c0_6] : memref<128x128xf32, #tpu.memory_space<vmem>>, vector<128x128xf32>
    %cst_7 = arith.constant dense<0.000000e+00> : vector<8x128xf32>
    %7 = tpu.matmul %5, %6, %cst_7 {dimension_numbers = #tpu.dot_dimension_numbers<[1], [0], [0], [1], [0, 0, 1, 1], [], []>} : vector<8x128xf32>, vector<128x128xf32>, vector<8x128xf32> -> vector<8x128xf32>
    %c0_8 = arith.constant 0 : index
    %c0_9 = arith.constant 0 : index
    %8 = vector.load %arg8[%c0_8, %c0_9] : memref<1x128xf32, #tpu.memory_space<vmem>>, vector<1x128xf32>
    %9 = vector.broadcast %8 : vector<1x128xf32> to vector<8x128xf32>
    %10 = arith.addf %7, %9 : vector<8x128xf32>
    %cst_10 = arith.constant 5.000000e-01 : f32
    %11 = vector.broadcast %cst_10 : f32 to vector<8x128xf32>
    %12 = arith.mulf %11, %10 : vector<8x128xf32>
    %cst_11 = arith.constant 0.707106769 : f32
    %13 = vector.broadcast %cst_11 : f32 to vector<8x128xf32>
    %14 = arith.mulf %10, %13 : vector<8x128xf32>
    %15 = math.erf %14 : vector<8x128xf32>
    %cst_12 = arith.constant 1.000000e+00 : f32
    %16 = vector.broadcast %cst_12 : f32 to vector<8x128xf32>
    %17 = arith.addf %16, %15 : vector<8x128xf32>
    %18 = arith.mulf %12, %17 : vector<8x128xf32>
    %c0_13 = arith.constant 0 : index
    %c0_14 = arith.constant 0 : index
    %19 = vector.load %arg9[%c0_13, %c0_14] : memref<128x128xf32, #tpu.memory_space<vmem>>, vector<128x128xf32>
    %cst_15 = arith.constant dense<0.000000e+00> : vector<8x128xf32>
    %20 = tpu.matmul %18, %19, %cst_15 {dimension_numbers = #tpu.dot_dimension_numbers<[1], [0], [0], [1], [0, 0, 1, 1], [], []>} : vector<8x128xf32>, vector<128x128xf32>, vector<8x128xf32> -> vector<8x128xf32>
    %c0_16 = arith.constant 0 : index
    %c0_17 = arith.constant 0 : index
    %21 = vector.load %arg10[%c0_16, %c0_17] : memref<1x128xf32, #tpu.memory_space<vmem>>, vector<1x128xf32>
    %22 = vector.broadcast %21 : vector<1x128xf32> to vector<8x128xf32>
    %23 = arith.addf %20, %22 : vector<8x128xf32>
    %c0_18 = arith.constant 0 : index
    %c0_19 = arith.constant 0 : index
    %24 = vector.load %arg2[%c0_18, %c0_19] : memref<40x1xi32, #tpu.memory_space<vmem>>, vector<40x1xi32>
    %c0_20 = arith.constant 0 : index
    %c0_21 = arith.constant 0 : index
    %25 = vector.load %arg3[%c0_20, %c0_21] : memref<40x1xi32, #tpu.memory_space<vmem>>, vector<40x1xi32>
    %c0_22 = arith.constant 0 : index
    %c0_23 = arith.constant 0 : index
    %26 = vector.load %arg4[%c0_22, %c0_23] : memref<40x1xi32, #tpu.memory_space<vmem>>, vector<40x1xi32>
    %27 = tpu.iota {dimensions = array<i32: 1>} : vector<40x256xi32>
    %28 = vector.broadcast %24 : vector<40x1xi32> to vector<40x256xi32>
    %29 = arith.cmpi eq, %27, %28 : vector<40x256xi32>
    %c0_i32 = arith.constant 0 : i32
    %30 = vector.broadcast %c0_i32 : i32 to vector<40x1xi32>
    %31 = arith.cmpi slt, %25, %30 : vector<40x1xi32>
    %32 = vector.broadcast %31 : vector<40x1xi1> to vector<40x256xi1>
    %33 = arith.andi %29, %32 : vector<40x256xi1>
    %cst_24 = arith.constant 1.000000e+00 : f32
    %cst_25 = arith.constant 0.000000e+00 : f32
    %34 = vector.broadcast %cst_24 : f32 to vector<40x256xf32>
    %35 = vector.broadcast %cst_25 : f32 to vector<40x256xf32>
    %36 = arith.select %33, %34, %35 : vector<40x256xi1>, vector<40x256xf32>
    %c0_26 = arith.constant 0 : index
    %c0_27 = arith.constant 0 : index
    %37 = vector.load %arg11[%c0_26, %c0_27] : memref<256x128xf32, #tpu.memory_space<vmem>>, vector<256x128xf32>
    %cst_28 = arith.constant dense<0.000000e+00> : vector<40x128xf32>
    %38 = tpu.matmul %36, %37, %cst_28 {dimension_numbers = #tpu.dot_dimension_numbers<[1], [0], [0], [1], [0, 0, 1, 1], [], []>} : vector<40x256xf32>, vector<256x128xf32>, vector<40x128xf32> -> vector<40x128xf32>
    %39 = tpu.iota {dimensions = array<i32: 1>} : vector<40x8xi32>
    %40 = vector.broadcast %25 : vector<40x1xi32> to vector<40x8xi32>
    %41 = arith.cmpi eq, %39, %40 : vector<40x8xi32>
    %cst_29 = arith.constant 1.000000e+00 : f32
    %cst_30 = arith.constant 0.000000e+00 : f32
    %42 = vector.broadcast %cst_29 : f32 to vector<40x8xf32>
    %43 = vector.broadcast %cst_30 : f32 to vector<40x8xf32>
    %44 = arith.select %41, %42, %43 : vector<40x8xi1>, vector<40x8xf32>
    %cst_31 = arith.constant dense<0.000000e+00> : vector<40x128xf32>
    %45 = tpu.matmul %44, %23, %cst_31 {dimension_numbers = #tpu.dot_dimension_numbers<[1], [0], [0], [1], [0, 0, 1, 1], [], []>} : vector<40x8xf32>, vector<8x128xf32>, vector<40x128xf32> -> vector<40x128xf32>
    %46 = arith.addf %38, %45 : vector<40x128xf32>
    %c0_32 = arith.constant 0 : index
    %c0_33 = arith.constant 0 : index
    %47 = vector.load %arg12[%c0_32, %c0_33] : memref<128x256xf32, #tpu.memory_space<vmem>>, vector<128x256xf32>
    %cst_34 = arith.constant dense<0.000000e+00> : vector<40x256xf32>
    %48 = tpu.matmul %46, %47, %cst_34 {dimension_numbers = #tpu.dot_dimension_numbers<[1], [0], [0], [1], [0, 0, 1, 1], [], []>} : vector<40x128xf32>, vector<128x256xf32>, vector<40x256xf32> -> vector<40x256xf32>
    %c0_35 = arith.constant 0 : index
    %c0_36 = arith.constant 0 : index
    %49 = vector.load %arg13[%c0_35, %c0_36] : memref<1x256xf32, #tpu.memory_space<vmem>>, vector<1x256xf32>
    %50 = vector.broadcast %49 : vector<1x256xf32> to vector<40x256xf32>
    %51 = arith.addf %48, %50 : vector<40x256xf32>
    %cst_37 = arith.constant dense<0xFF800000> : vector<40xf32>
    %52 = vector.multi_reduction <maximumf>, %51, %cst_37 [1] : vector<40x256xf32> to vector<40xf32>
    %53 = vector.shape_cast %52 : vector<40xf32> to vector<40x1xf32>
    %54 = vector.broadcast %53 : vector<40x1xf32> to vector<40x256xf32>
    %55 = arith.subf %51, %54 : vector<40x256xf32>
    %56 = math.exp %55 : vector<40x256xf32>
    %cst_38 = arith.constant dense<0.000000e+00> : vector<40xf32>
    %57 = vector.multi_reduction <add>, %56, %cst_38 [1] : vector<40x256xf32> to vector<40xf32>
    %58 = vector.shape_cast %57 : vector<40xf32> to vector<40x1xf32>
    %59 = math.log %58 : vector<40x1xf32>
    %60 = arith.addf %59, %53 : vector<40x1xf32>
    %61 = vector.broadcast %26 : vector<40x1xi32> to vector<40x256xi32>
    %62 = arith.cmpi eq, %27, %61 : vector<40x256xi32>
    %cst_39 = arith.constant 0.000000e+00 : f32
    %63 = vector.broadcast %cst_39 : f32 to vector<40x256xf32>
    %64 = arith.select %62, %51, %63 : vector<40x256xi1>, vector<40x256xf32>
    %cst_40 = arith.constant dense<0.000000e+00> : vector<40xf32>
    %65 = vector.multi_reduction <add>, %64, %cst_40 [1] : vector<40x256xf32> to vector<40xf32>
    %66 = vector.shape_cast %65 : vector<40xf32> to vector<40x1xf32>
    %c-100_i32 = arith.constant -100 : i32
    %67 = vector.broadcast %c-100_i32 : i32 to vector<40x1xi32>
    %68 = arith.cmpi ne, %26, %67 : vector<40x1xi32>
    %69 = arith.extui %68 : vector<40x1xi1> to vector<40x1xi32>
    %70 = arith.sitofp %69 : vector<40x1xi32> to vector<40x1xf32>
    %71 = arith.subf %60, %66 : vector<40x1xf32>
    %72 = arith.mulf %71, %70 : vector<40x1xf32>
    %73 = vector.shape_cast %72 : vector<40x1xf32> to vector<1x40x1xf32>
    %cst_41 = arith.constant dense<0.000000e+00> : vector<1xf32>
    %74 = vector.multi_reduction <add>, %73, %cst_41 [1, 2] : vector<1x40x1xf32> to vector<1xf32>
    %75 = vector.shape_cast %74 : vector<1xf32> to vector<1x1x1xf32>
    %76 = vector.extract %75[0, 0, 0] : f32 from vector<1x1x1xf32>
    %77 = vector.shape_cast %70 : vector<40x1xf32> to vector<1x40x1xf32>
    %cst_42 = arith.constant dense<0.000000e+00> : vector<1xf32>
    %78 = vector.multi_reduction <add>, %77, %cst_42 [1, 2] : vector<1x40x1xf32> to vector<1xf32>
    %79 = vector.shape_cast %78 : vector<1xf32> to vector<1x1x1xf32>
    %80 = vector.extract %79[0, 0, 0] : f32 from vector<1x1x1xf32>
    %cst_43 = arith.constant 1.000000e+00 : f32
    %81 = arith.maximumf %80, %cst_43 : f32
    %82 = arith.divf %76, %81 : f32
    %83 = tpu.iota {dimensions = array<i32: 1>} : vector<1x128xi32>
    %c0_i32_44 = arith.constant 0 : i32
    %84 = vector.broadcast %c0_i32_44 : i32 to vector<1x128xi32>
    %85 = arith.cmpi eq, %83, %84 : vector<1x128xi32>
    %c1_i32 = arith.constant 1 : i32
    %86 = vector.broadcast %c1_i32 : i32 to vector<1x128xi32>
    %87 = arith.cmpi eq, %83, %86 : vector<1x128xi32>
    %c2_i32 = arith.constant 2 : i32
    %88 = vector.broadcast %c2_i32 : i32 to vector<1x128xi32>
    %89 = arith.cmpi eq, %83, %88 : vector<1x128xi32>
    %cst_45 = arith.constant 0.000000e+00 : f32
    %90 = vector.broadcast %80 : f32 to vector<1x128xf32>
    %91 = vector.broadcast %cst_45 : f32 to vector<1x128xf32>
    %92 = arith.select %89, %90, %91 : vector<1x128xi1>, vector<1x128xf32>
    %93 = vector.broadcast %76 : f32 to vector<1x128xf32>
    %94 = arith.select %87, %93, %92 : vector<1x128xi1>, vector<1x128xf32>
    %95 = vector.broadcast %82 : f32 to vector<1x128xf32>
    %96 = arith.select %85, %95, %94 : vector<1x128xi1>, vector<1x128xf32>
    %c0_46 = arith.constant 0 : index
    %c0_47 = arith.constant 0 : index
    %97 = vector.load %arg14[%c0_46, %c0_47] : memref<1x128xf32, #tpu.memory_space<vmem>>, vector<1x128xf32>
    tpu.vector_store %arg14[%c0_46, %c0_47], %96 {strides = array<i32>} : memref<1x128xf32, #tpu.memory_space<vmem>>, vector<1x128xf32>,
    return
  }
  func.func @transform_0(%arg0: i32) -> (i32, i32) {
    %c0_i32 = arith.constant 0 : i32
    %c0_i32_0 = arith.constant 0 : i32
    %c0_i32_1 = arith.constant 0 : i32
    return %c0_i32, %c0_i32_0 : i32, i32
  }
  func.func @transform_1(%arg0: i32) -> (i32, i32) {
    %c0_i32 = arith.constant 0 : i32
    %c0_i32_0 = arith.constant 0 : i32
    %c0_i32_1 = arith.constant 0 : i32
    return %c0_i32, %c0_i32_0 : i32, i32
  }
  func.func @transform_2(%arg0: i32) -> (i32, i32) {
    %c0_i32 = arith.constant 0 : i32
    %c0_i32_0 = arith.constant 0 : i32
    %c0_i32_1 = arith.constant 0 : i32
    return %c0_i32, %c0_i32_0 : i32, i32
  }
  func.func @transform_3(%arg0: i32) -> (i32, i32) {
    %c0_i32 = arith.constant 0 : i32
    %c0_i32_0 = arith.constant 0 : i32
    %c0_i32_1 = arith.constant 0 : i32
    return %c0_i32, %c0_i32_0 : i32, i32
  }
  func.func @transform_4(%arg0: i32) -> (i32, i32) {
    %c0_i32 = arith.constant 0 : i32
    %c0_i32_0 = arith.constant 0 : i32
    %c0_i32_1 = arith.constant 0 : i32
    return %c0_i32, %c0_i32_0 : i32, i32
  }
  func.func @transform_5(%arg0: i32) -> (i32, i32) {
    %c0_i32 = arith.constant 0 : i32
    %c0_i32_0 = arith.constant 0 : i32
    %c0_i32_1 = arith.constant 0 : i32
    return %c0_i32, %c0_i32_0 : i32, i32
  }
  func.func @transform_6(%arg0: i32) -> (i32, i32) {
    %c0_i32 = arith.constant 0 : i32
    %c0_i32_0 = arith.constant 0 : i32
    %c0_i32_1 = arith.constant 0 : i32
    return %c0_i32, %c0_i32_0 : i32, i32
  }
  func.func @transform_7(%arg0: i32) -> (i32, i32) {
    %c0_i32 = arith.constant 0 : i32
    %c0_i32_0 = arith.constant 0 : i32
    %c0_i32_1 = arith.constant 0 : i32
    return %c0_i32, %c0_i32_0 : i32, i32
  }
  func.func @transform_8(%arg0: i32) -> (i32, i32) {
    %c0_i32 = arith.constant 0 : i32
    %c0_i32_0 = arith.constant 0 : i32
    %c0_i32_1 = arith.constant 0 : i32
    return %c0_i32, %c0_i32_0 : i32, i32
  }
  func.func @transform_9(%arg0: i32) -> (i32, i32) {
    %c0_i32 = arith.constant 0 : i32
    %c0_i32_0 = arith.constant 0 : i32
    %c0_i32_1 = arith.constant 0 : i32
    return %c0_i32, %c0_i32_0 : i32, i32
  }
  func.func @transform_10(%arg0: i32) -> (i32, i32) {
    %c0_i32 = arith.constant 0 : i32
    %c0_i32_0 = arith.constant 0 : i32
    %c0_i32_1 = arith.constant 0 : i32
    return %c0_i32, %c0_i32_0 : i32, i32
  }
  func.func @transform_11(%arg0: i32) -> (i32, i32) {
    %c0_i32 = arith.constant 0 : i32
    %c0_i32_0 = arith.constant 0 : i32
    %c0_i32_1 = arith.constant 0 : i32
    return %c0_i32, %c0_i32_0 : i32, i32
  }
  func.func @transform_12(%arg0: i32) -> (i32, i32) {
    %c0_i32 = arith.constant 0 : i32
    %c0_i32_0 = arith.constant 0 : i32
    %c0_i32_1 = arith.constant 0 : i32
    return %c0_i32, %c0_i32_0 : i32, i32
  }
  func.func @transform_13(%arg0: i32) -> (i32, i32) {
    %c0_i32 = arith.constant 0 : i32
    %c0_i32_0 = arith.constant 0 : i32
    %c0_i32_1 = arith.constant 0 : i32
    return %c0_i32, %c0_i32_0 : i32, i32
  }
}

</mosaic_0001>

<bundles_post_ra>
// kernel: mini_llava_forward.1
= control target key start
LH: loop header
LB: loop body
LE: loop exit
PB: predicated region body
PF: predicated region fallthrough
CT: control target
= control target key end

     0   :  { %v1513_v7 = vmov 0.0|0.0   ;;  %s2242_s0 = inlined_call_operand.vmem [shape: f32[8,256], index: 0, kind: input, shape index: {}]   ;;  %s2243_s1 = inlined_call_operand.vmem [shape: s32[40,1], index: 1, kind: input, shape index: {}]   ;;  %s2244_s2 = inlined_call_operand.vmem [shape: s32[40,1], index: 2, kind: input, shape index: {}]   ;;  %s2245_s3 = inlined_call_operand.vmem [shape: s32[40,1], index: 3, kind: input, shape index: {}]   ;;  %s2246_s4 = inlined_call_operand.vmem [shape: f32[256,128], index: 4, kind: input, shape index: {}]   ;;  %s2247_s5 = inlined_call_operand.vmem [shape: f32[1,128], index: 5, kind: input, shape index: {}]   ;;  %s2248_s6 = inlined_call_operand.vmem [shape: f32[128,128], index: 6, kind: input, shape index: {}]   ;;  %s2249_s7 = inlined_call_operand.vmem [shape: f32[1,128], index: 7, kind: input, shape index: {}]   ;;  %s2250_s8 = inlined_call_operand.vmem [shape: f32[128,128], index: 8, kind: input, shape index: {}]   ;;  %s2251_s9 = inlined_call_operand.vmem [shape: f32[1,128], index: 9, kind: input, shape index: {}]   ;;  %s2252_s10 = inlined_call_operand.vmem [shape: f32[256,128], index: 10, kind: input, shape index: {}]   ;;  %s2253_s11 = inlined_call_operand.vmem [shape: f32[128,256], index: 11, kind: input, shape index: {}]   ;;  %s2254_s12 = inlined_call_operand.vmem [shape: f32[1,256], index: 12, kind: input, shape index: {}]   ;;  %s2255_s13 = inlined_call_operand.hbm [shape: f32[1,128], index: 13, kind: output, shape index: {}]  }
   0x1   :  { %v63_v0 = vld [vmem:[%s2246_s4 + $0x80] sm:$0xff]  ;;  %v64_v1 = vld [vmem:[%s2246_s4 + $0x88] sm:$0xff]  ;;  %v65_v5 = vld [vmem:[%s2246_s4 + $0x90] sm:$0xff]  ;;  %1312 = vmatprep.subr.bf16.mxu1 %v1513_v7 }
   0x2   :  { %v47_v2 = vld [vmem:[%s2246_s4] sm:$0xff]  ;;  %v1280_v3 = vpack.c.bf16 %v64_v1, %v63_v0  ;;  %v48_v4 = vld [vmem:[%s2246_s4 + $0x8] sm:$0xff]  ;;  %v66_v6 = vld [vmem:[%s2246_s4 + $0x98] sm:$0xff] }
   0x3   :  { %v1282_v8 = vpack.c.bf16 %v48_v4, %v47_v2  ;;  %v1284_v9 = vpack.c.bf16 %v66_v6, %v65_v5  ;;  %v49_v10 = vld [vmem:[%s2246_s4 + $0x10] sm:$0xff]  ;;  %v50_v11 = vld [vmem:[%s2246_s4 + $0x18] sm:$0xff]  ;;  %v67_v12 = vld [vmem:[%s2246_s4 + $0xa0] sm:$0xff] }
   0x4   :  { %1281 = vmatprep.subr.bf16.mxu0 %v1280_v3  ;;  %v68_v13 = vld [vmem:[%s2246_s4 + $0xa8] sm:$0xff]  ;;  %v1286_v14 = vpack.c.bf16 %v50_v11, %v49_v10  ;;  %v51_v16 = vld [vmem:[%s2246_s4 + $0x20] sm:$0xff]  ;;  %v69_v18 = vld [vmem:[%s2246_s4 + $0xb0] sm:$0xff] }
   0x5   :  { %1283 = vmatpush3.bf16.msra.mxu0 %v1282_v8  ;;  %v1288_v15 = vpack.c.bf16 %v68_v13, %v67_v12  ;;  %v52_v17 = vld [vmem:[%s2246_s4 + $0x28] sm:$0xff]  ;;  %v70_v19 = vld [vmem:[%s2246_s4 + $0xb8] sm:$0xff]  ;;  %v53_v22 = vld [vmem:[%s2246_s4 + $0x30] sm:$0xff] }
   0x6   :  { %1285 = vmatprep.subr.bf16.mxu0 %v1284_v9  ;;  %v1290_v20 = vpack.c.bf16 %v52_v17, %v51_v16  ;;  %v1292_v21 = vpack.c.bf16 %v70_v19, %v69_v18  ;;  %v54_v23 = vld [vmem:[%s2246_s4 + $0x38] sm:$0xff]  ;;  %v71_v24 = vld [vmem:[%s2246_s4 + $0xc0] sm:$0xff]  ;;  %v72_v25 = vld [vmem:[%s2246_s4 + $0xc8] sm:$0xff] }
   0x7   :  { %v46_v26 = vld [vmem:[%s2242_s0 + $0x8] sm:$0xff]  ;;  %v156_v27 = vld [vmem:[%s2248_s6] sm:$0xff]  ;;  %v1294_v29 = vpack.c.bf16 %v54_v23, %v53_v22  ;;  %v158_v31 = vld [vmem:[%s2248_s6 + $0x10] sm:$0xff]  ;;  %v1296_v33 = vpack.c.bf16 %v72_v25, %v71_v24 }
   0x8   :  { %150 = vmatprep.mubr.f32.mxu0 %v46_v26  ;;  %v157_v28 = vld [vmem:[%s2248_s6 + $0x8] sm:$0xff]  ;;  %v159_v32 = vld [vmem:[%s2248_s6 + $0x18] sm:$0xff]  ;;  %v55_v34 = vld [vmem:[%s2246_s4 + $0x40] sm:$0xff] }
   0x9   :  { %1287 = vmatpush3.bf16.msra.mxu0 %v1286_v14  ;;  %v1313_v30 = vpack.c.bf16 %v157_v28, %v156_v27  ;;  %v56_v35 = vld [vmem:[%s2246_s4 + $0x48] sm:$0xff]  ;;  %v73_v36 = vld [vmem:[%s2246_s4 + $0xd0] sm:$0xff]  ;;  %v74_v37 = vld [vmem:[%s2246_s4 + $0xd8] sm:$0xff]  ;;  %v1316_v38 = vpack.c.bf16 %v159_v32, %v158_v31 }
   0xa   :  { %1289 = vmatprep.subr.bf16.mxu0 %v1288_v15  ;;  %v160_v39 = vld [vmem:[%s2248_s6 + $0x20] sm:$0xff]  ;;  %v161_v40 = vld [vmem:[%s2248_s6 + $0x28] sm:$0xff]  ;;  %v1298_v41 = vpack.c.bf16 %v56_v35, %v55_v34 }
   0xb   :  { %1314 = vmatpush3.bf16.msra.mxu1 %v1313_v30 }
   0xc   :  { %1315 = vmatprep.subr.bf16.mxu1 %v1513_v7 }
   0xd   :  { %1291 = vmatpush3.bf16.msra.mxu0 %v1290_v20 }
   0xe   :  { %1293 = vmatprep.subr.bf16.mxu0 %v1292_v21 }
  0x11   :  { %1295 = vmatpush3.bf16.msra.mxu0 %v1294_v29 }
  0x12   :  { %18 = vsyncpa [#allocation3], 0  ;;  %1297 = vmatprep.subr.bf16.mxu0 %v1296_v33  ;;  %v1300_v42 = vpack.c.bf16 %v74_v37, %v73_v36  ;;  %v57_v43 = vld [vmem:[%s2246_s4 + $0x50] sm:$0xff]  ;;  %v58_v44 = vld [vmem:[%s2246_s4 + $0x58] sm:$0xff]  ;;  %1317 = vmatpush3.bf16.msra.mxu1 %v1316_v38  ;;  %v1319_v47 = vpack.c.bf16 %v161_v40, %v160_v39  ;;  %vm1514_vm0 = vmmov 0   ;;  %v1515_v12 = vmov 0.0  }
  0x13   :  { %v75_v45 = vld [vmem:[%s2246_s4 + $0xe0] sm:$0xff]  ;;  %v76_v46 = vld [vmem:[%s2246_s4 + $0xe8] sm:$0xff]  ;;  %1318 = vmatprep.subr.bf16.mxu1 %v1513_v7  ;;  %v162_v48 = vld [vmem:[%s2248_s6 + $0x30] sm:$0xff]  ;;  %v1302_v50 = vpack.c.bf16 %v58_v44, %v57_v43  ;;  %1225 = vmatprep.mubr.msk.f32.mxu1 %vm1514_vm0, %v1515_v12  ;;  %v1516_v44 = vmov 0   ;;  %vm497_vm7 = vcmask 64512   ;;  %s1519_s21 = smov [#allocation2]  }
  0x14   :  { %v163_v49 = vld [vmem:[%s2248_s6 + $0x38] sm:$0xff]  ;;  %v1304_v51 = vpack.c.bf16 %v76_v46, %v75_v45  ;;  %v59_v52 = vld [vmem:[%s2246_s4 + $0x60] sm:$0xff]  ;;  %v60_v53 = vld [vmem:[%s2246_s4 + $0x68] sm:$0xff]  ;;  %1453 = vset.pattern.permute.xlu0 %v1516_v44  ;;  %1454 = vset.pattern.permute.xlu1 %v1516_v44 }
  0x15   :  { %1299 = vmatpush3.bf16.msra.mxu0 %v1298_v41  ;;  %v77_v54 = vld [vmem:[%s2246_s4 + $0xf0] sm:$0xff]  ;;  %v78_v55 = vld [vmem:[%s2246_s4 + $0xf8] sm:$0xff]  ;;  %v1322_v56 = vpack.c.bf16 %v163_v49, %v162_v48  ;;  %v164_v57 = vld [vmem:[%s2248_s6 + $0x40] sm:$0xff]  ;;  %v1306_v59 = vpack.c.bf16 %v60_v53, %v59_v52 }
  0x16   :  { %1301 = vmatprep.subr.bf16.mxu0 %v1300_v42  ;;  %1320 = vmatpush3.bf16.msra.mxu1 %v1319_v47  ;;  %v165_v58 = vld [vmem:[%s2248_s6 + $0x48] sm:$0xff]  ;;  %v1308_v60 = vpack.c.bf16 %v78_v55, %v77_v54  ;;  %v61_v61 = vld [vmem:[%s2246_s4 + $0x70] sm:$0xff]  ;;  %v62_v62 = vld [vmem:[%s2246_s4 + $0x78] sm:$0xff] }
  0x17   :  { %1321 = vmatprep.subr.bf16.mxu1 %v1513_v7  ;;  %v1325_v63 = vpack.c.bf16 %v165_v58, %v164_v57  ;;  %v166_v0 = vld [vmem:[%s2248_s6 + $0x50] sm:$0xff]  ;;  %v167_v1 = vld [vmem:[%s2248_s6 + $0x58] sm:$0xff]  ;;  %v1310_v2 = vpack.c.bf16 %v62_v62, %v61_v61  ;;  %v168_v4 = vld [vmem:[%s2248_s6 + $0x60] sm:$0xff] }
  0x18   :  { %v1328_v3 = vpack.c.bf16 %v167_v1, %v166_v0  ;;  %v169_v5 = vld [vmem:[%s2248_s6 + $0x68] sm:$0xff]  ;;  %v45_v6 = vld [vmem:[%s2242_s0] sm:$0xff]  ;;  %v170_v9 = vld [vmem:[%s2248_s6 + $0x70] sm:$0xff]  ;;  %s1040_s0 = sshll.u32 %s1519_s21, 4  ;;  %s1041_s0 = int_to_ptr.vmem [resolvable:$true] %s1040_s0 }
  0x19   :  { %1303 = vmatpush3.bf16.msra.mxu0 %v1302_v50  ;;  %v1331_v8 = vpack.c.bf16 %v169_v5, %v168_v4  ;;  %v171_v10 = vld [vmem:[%s2248_s6 + $0x78] sm:$0xff]  ;;  %v254_v13 = vld [vmem:[%s2250_s8] sm:$0xff]  ;;  %v255_v14 = vld [vmem:[%s2250_s8 + $0x8] sm:$0xff]  ;;  %s1489_s23 = scalar_lea.vmem %s1041_s0, 16  ;;  %s1493_s24 = scalar_lea.vmem %s1041_s0, 32 }
  0x1a   :  { %1305 = vmatprep.subr.bf16.mxu0 %v1304_v51  ;;  %1323 = vmatpush3.bf16.msra.mxu1 %v1322_v56  ;;  %v1334_v11 = vpack.c.bf16 %v171_v10, %v170_v9  ;;  %v256_v15 = vld [vmem:[%s2250_s8 + $0x10] sm:$0xff]  ;;  %v1337_v16 = vpack.c.bf16 %v255_v14, %v254_v13  ;;  %v257_v17 = vld [vmem:[%s2250_s8 + $0x18] sm:$0xff]  ;;  %v258_v19 = vld [vmem:[%s2250_s8 + $0x20] sm:$0xff]  ;;  %p1490_p0 = scmp.ne.s32.totalorder %s1041_s0, %s1489_s23  ;;  %p1494_p1 = scmp.lt.s32.totalorder %s1041_s0, %s1041_s0 }
  0x1b   :  { %1324 = vmatprep.subr.bf16.mxu1 %v1513_v7  ;;  %v1340_v18 = vpack.c.bf16 %v257_v17, %v256_v15  ;;  %v259_v20 = vld [vmem:[%s2250_s8 + $0x28] sm:$0xff]  ;;  %v1048_v23 = vld [vmem:[%s2247_s5] ss:$0 sm:$0xff]  ;;  %v260_v27 = vld [vmem:[%s2250_s8 + $0x30] sm:$0xff]  ;;  %s1518_s5 = smov 1.0   ;;  %p1495_p2 = scmp.lt.s32.totalorder %s1493_s24, %s1489_s23 }
  0x1c   :  { %v1343_v21 = vpack.c.bf16 %v259_v20, %v258_v19  ;;  %v261_v28 = vld [vmem:[%s2250_s8 + $0x38] sm:$0xff]  ;;  %v262_v30 = vld [vmem:[%s2250_s8 + $0x40] sm:$0xff]  ;;  %v263_v31 = vld [vmem:[%s2250_s8 + $0x48] sm:$0xff] }
  0x1d   :  { %1307 = vmatpush3.bf16.msra.mxu0 %v1306_v59  ;;  %v1346_v29 = vpack.c.bf16 %v261_v28, %v260_v27  ;;  %v1349_v32 = vpack.c.bf16 %v263_v31, %v262_v30  ;;  %v264_v33 = vld [vmem:[%s2250_s8 + $0x50] sm:$0xff]  ;;  %v265_v34 = vld [vmem:[%s2250_s8 + $0x58] sm:$0xff]  ;;  %v266_v36 = vld [vmem:[%s2250_s8 + $0x60] sm:$0xff]  ;;  %p1496_p3 = por %p1495_p2, %p1494_p1 }
  0x1e   :  { %1309 = vmatprep.subr.bf16.mxu0 %v1308_v60  ;;  %1326 = vmatpush3.bf16.msra.mxu1 %v1325_v63  ;;  %v1352_v35 = vpack.c.bf16 %v265_v34, %v264_v33  ;;  %v267_v37 = vld [vmem:[%s2250_s8 + $0x68] sm:$0xff]  ;;  %v268_v39 = vld [vmem:[%s2250_s8 + $0x70] sm:$0xff]  ;;  %v269_v40 = vld [vmem:[%s2250_s8 + $0x78] sm:$0xff] }
  0x1f   :  { %1327 = vmatprep.subr.bf16.mxu1 %v1513_v7  ;;  %v1355_v38 = vpack.c.bf16 %v267_v37, %v266_v36  ;;  %v1358_v41 = vpack.c.bf16 %v269_v40, %v268_v39  ;;  %v352_v42 = vld [vmem:[%s2244_s2] sm:$0xff]  ;;  %v354_v43 = vld [vmem:[%s2244_s2 + $0x10] sm:$0xff]  ;;  %v355_v45 = vld [vmem:[%s2244_s2 + $0x18] sm:$0xff]  ;;  %p1497_p4 = pnand %p1496_p3, %p1490_p0 }
  0x20   :  { %473 = vperm.xlu0 %1453, %v352_v42   ;;  %479 = vperm.xlu1 %1454, %v354_v43   ;;  %v356_v46 = vld [vmem:[%s2244_s2 + $0x20] sm:$0xff]  ;;  %vm390_vm1 = vcmp.lt.s32.totalorder %v352_v42, 0  ;;  %v348_v49 = vld [vmem:[%s2243_s1 + $0x8] sm:$0xff]  ;;  %v349_v51 = vld [vmem:[%s2243_s1 + $0x10] sm:$0xff]  ;;  %vm392_vm3 = vcmp.lt.s32.totalorder %v354_v43, 0  ;;  %vm393_vm4 = vcmp.lt.s32.totalorder %v355_v45, 0 }
  0x21   :  { %1311 = vmatpush3.bf16.msra.mxu0 %v1310_v2  ;;  %v347_v47 = vld [vmem:[%s2243_s1] sm:$0xff]  ;;  %v395_v48 = vsel %vm390_vm1, 1, %v1516_v44  ;;  %v397_v52 = vsel %vm392_vm3, 1, %v1516_v44  ;;  %v350_v53 = vld [vmem:[%s2243_s1 + $0x18] sm:$0xff]  ;;  %v398_v54 = vsel %vm393_vm4, 1, %v1516_v44  ;;  %vm394_vm5 = vcmp.lt.s32.totalorder %v356_v46, 0 }
  0x22   :  { %1336 = vmatprep.subr.bf16.mxu0 %v1513_v7  ;;  %1329 = vmatpush3.bf16.msra.mxu1 %v1328_v3  ;;  %v351_v55 = vld [vmem:[%s2243_s1 + $0x20] sm:$0xff]  ;;  %v399_v56 = vsel %vm394_vm5, 1, %v1516_v44  ;;  %v362_v3 = vlaneseq  ;;  %v458_v13 = vld [vmem:[%s2252_s10 + $0x90] sm:$0xff]  ;;  %v459_v14 = vld [vmem:[%s2252_s10 + $0x98] sm:$0xff] }
  0x23   :  { %1330 = vmatprep.subr.bf16.mxu1 %v1513_v7  ;;  %v1847_v57 = vld [vmem:[%s2245_s3] sm:$0xff]  ;;  %v461_v27 = vld [vmem:[%s2252_s10 + $0xa8] sm:$0xff]  ;;  %v462_v33 = vld [vmem:[%s2252_s10 + $0xb0] sm:$0xff] }
  0x24   :  { %151 = vmatmul.mubr.f32.vlgmr.msra.gmra.mrb[0].mxu0 %v45_v6  ;;  %482 = vperm.xlu1 %1454, %v355_v45   ;;  %v1049_v58 = vld [vmem:[%s2249_s7] ss:$0 sm:$0xff]  ;;  %v1855_v4 = vand.u32 127, %v362_v3  ;;  %v445_v31 = vld [vmem:[%s2252_s10 + $0x28] sm:$0xff]  ;;  %v463_v34 = vld [vmem:[%s2252_s10 + $0xb8] sm:$0xff] }
  0x25   :  { %1260 = vmatprep.mubr.msk.f32.mxu0 %vm1514_vm0, %v1515_v12  ;;  %1338 = vmatpush3.bf16.msra.mxu0 %v1337_v16  ;;  %v456_v6 = vld [vmem:[%s2252_s10 + $0x80] sm:$0xff]  ;;  %v1372_v39 = vpack.c.bf16 %v463_v34, %v462_v33  ;;  %v446_v40 = vld [vmem:[%s2252_s10 + $0x30] sm:$0xff]  ;;  %v465_v43 = vld [vmem:[%s2252_s10 + $0xc8] sm:$0xff] }
  0x26   :  { %1332 = vmatpush3.bf16.msra.mxu1 %v1331_v8  ;;  %1339 = vmatprep.subr.bf16.mxu0 %v1513_v7  ;;  %v457_v8 = vld [vmem:[%s2252_s10 + $0x88] sm:$0xff]  ;;  %v1050_v9 = vld [vmem:[%s2251_s9] ss:$0 sm:$0xff]  ;;  %v704_v34 = vld [vmem:[%s2253_s11 + $0x58] sm:$0xff] }
  0x27   :  { %1333 = vmatprep.subr.bf16.mxu1 %v1513_v7  ;;  %v440_v10 = vld [vmem:[%s2252_s10] sm:$0xff]  ;;  %v1360_v16 = vpack.c.bf16 %v457_v8, %v456_v6  ;;  %v702_v33 = vld [vmem:[%s2253_s11 + $0x48] sm:$0xff] }
  0x28   :  { %366 = vperm.xlu1 %1454, %v347_v47   ;;  %v444_v30 = vld [vmem:[%s2252_s10 + $0x20] sm:$0xff] }
  0x29   :  { %1341 = vmatpush3.bf16.msra.mxu0 %v1340_v18  ;;  %v1370_v37 = vpack.c.bf16 %v445_v31, %v444_v30  ;;  %v464_v42 = vld [vmem:[%s2252_s10 + $0xc0] sm:$0xff]  ;;  %v699_v31 = vld [vmem:[%s2253_s11 + $0x30] sm:$0xff] }
  0x2a   :  { %1335 = vmatpush3.bf16.msra.mxu1 %v1334_v11  ;;  %1342 = vmatprep.subr.bf16.mxu0 %v1513_v7  ;;  %v441_v11 = vld [vmem:[%s2252_s10 + $0x8] sm:$0xff]  ;;  %v448_v47 = vld [vmem:[%s2252_s10 + $0x40] sm:$0xff] }
  0x2b   :  { %1263 = vmatprep.subr.mxu1 %v1515_v12  ;;  %v1362_v20 = vpack.c.bf16 %v441_v11, %v440_v10  ;;  %v454_v11 = vld [vmem:[%s2252_s10 + $0x70] sm:$0xff] }
  0x2c   :  { %369 = vperm.xlu1 %1454, %v348_v49   ;;  %v466_v49 = vld [vmem:[%s2252_s10 + $0xd0] sm:$0xff] }
  0x2d   :  { %1344 = vmatpush3.bf16.msra.mxu0 %v1343_v21  ;;  %v1364_v21 = vpack.c.bf16 %v459_v14, %v458_v13  ;;  %v455_v13 = vld [vmem:[%s2252_s10 + $0x78] sm:$0xff] }
  0x2e   :  { %1345 = vmatprep.subr.bf16.mxu0 %v1513_v7  ;;  %v1390_v14 = vpack.c.bf16 %v455_v13, %v454_v11 }
  0x30   :  { %372 = vperm.xlu1 %1454, %v349_v51  }
  0x31   :  { %1347 = vmatpush3.bf16.msra.mxu0 %v1346_v29 }
  0x32   :  { %1348 = vmatprep.subr.bf16.mxu0 %v1513_v7 }
  0x34   :  { %375 = vperm.xlu1 %1454, %v350_v53  }
  0x35   :  { %1350 = vmatpush3.bf16.msra.mxu0 %v1349_v32 }
  0x36   :  { %1351 = vmatprep.subr.bf16.mxu0 %v1513_v7 }
  0x38   :  { %378 = vperm.xlu1 %1454, %v351_v55   ;;  %v450_v55 = vld [vmem:[%s2252_s10 + $0x50] sm:$0xff] }
  0x39   :  { %1353 = vmatpush3.bf16.msra.mxu0 %v1352_v35 }
  0x3a   :  { %1354 = vmatprep.subr.bf16.mxu0 %v1513_v7 }
  0x3c   :  { %908 = vperm.xlu1 %1454, %v1847_v57  }
  0x3d   :  { %1356 = vmatpush3.bf16.msra.mxu0 %v1355_v38 }
  0x3e   :  { %1357 = vmatprep.subr.bf16.mxu0 %v1513_v7  ;;  %v353_v7 = vld [vmem:[%s2244_s2 + $0x8] sm:$0xff] }
  0x3f   :  { %476 = vperm.xlu0 %1453, %v353_v7   ;;  %vm391_vm2 = vcmp.lt.s32.totalorder %v353_v7, 0  ;;  %v1930_v7 = vadd.s32 128, %v1855_v4 }
  0x40   :  { %v396_v50 = vsel %vm391_vm2, 1, %v1516_v44 }
  0x41   :  { %1359 = vmatpush3.bf16.msra.mxu0 %v1358_v41  ;;  %v447_v41 = vld [vmem:[%s2252_s10 + $0x38] sm:$0xff] }
  0x42   :  { %v1374_v45 = vpack.c.bf16 %v447_v41, %v446_v40  ;;  %v708_v40 = vld [vmem:[%s2253_s11 + $0x78] sm:$0xff] }
  0x43   :  { %485 = vperm.xlu0 %1453, %v356_v46   ;;  %v1376_v46 = vpack.c.bf16 %v465_v43, %v464_v42  ;;  %v705_v42 = vld [vmem:[%s2253_s11 + $0x60] sm:$0xff]  ;;  %v707_v43 = vld [vmem:[%s2253_s11 + $0x70] sm:$0xff] }
  0x47   :  { %401 = vperm.xlu0 %1453, %v395_v48   ;;  %v449_v48 = vld [vmem:[%s2252_s10 + $0x48] sm:$0xff] }
  0x48   :  { %v1378_v53 = vpack.c.bf16 %v449_v48, %v448_v47  ;;  %v709_v47 = vld [vmem:[%s2253_s11 + $0x80] sm:$0xff] }
  0x4b   :  { %404 = vperm.xlu0 %1453, %v396_v50   ;;  %v467_v50 = vld [vmem:[%s2252_s10 + $0xd8] sm:$0xff] }
  0x4f   :  { %407 = vperm.xlu0 %1453, %v397_v52  }
  0x53   :  { %410 = vperm.xlu0 %1453, %v398_v54   ;;  %v1380_v54 = vpack.c.bf16 %v467_v50, %v466_v49  ;;  %v711_v49 = vld [vmem:[%s2253_s11 + $0x90] sm:$0xff]  ;;  %v714_v50 = vld [vmem:[%s2253_s11 + $0xa8] sm:$0xff] }
  0x57   :  { %413 = vperm.xlu0 %1453, %v399_v56   ;;  %v451_v56 = vld [vmem:[%s2252_s10 + $0x58] sm:$0xff] }
  0x9f   :  { %v474_v5 = vpop.permute.xlu0 %473 }
  0xa0   :  { %vm487_vm6 = vcmp.eq.s32.totalorder %v1855_v4, %v474_v5  ;;  %v471_v5 = vld [vmem:[%s2252_s10 + $0xf8] sm:$0xff] }
  0xa1   :  { %v492_v17 = vsel %vm487_vm6, 1.0, %v1515_v12 }
  0xf7   :  { %v1103_v22 = vpop.f32.mrb[0].mxu0 }
  0xf8   :  { %v1104_v24 = vpop.f32.mrb[1].mxu0 }
  0xf9   :  { %v1105_v25 = vadd.f32 %v1104_v24, %v1103_v22  ;;  %v442_v22 = vld [vmem:[%s2252_s10 + $0x10] sm:$0xff]  ;;  %v480_v24 = vpop.permute.xlu1 %479 }
  0xfa   :  { %vm489_vm9 = vcmp.eq.s32.totalorder %v1855_v4, %v480_v24  ;;  %v693_v24 = vld [vmem:[%s2253_s11] sm:$0xff] }
  0xfb   :  { %v153_v26 = vadd.f32 %v1105_v25, %v1048_v23  ;;  %v443_v23 = vld [vmem:[%s2252_s10 + $0x18] sm:$0xff]  ;;  %v477_v25 = vpop.permute.xlu0 %476  ;;  %v494_v35 = vsel %vm489_vm9, 1.0, %v1515_v12 }
  0xfc   :  { %vm488_vm8 = vcmp.eq.s32.totalorder %v1855_v4, %v477_v25  ;;  %v1366_v28 = vpack.c.bf16 %v443_v23, %v442_v22  ;;  %v696_v22 = vld [vmem:[%s2253_s11 + $0x18] sm:$0xff]  ;;  %v695_v25 = vld [vmem:[%s2253_s11 + $0x10] sm:$0xff] }
  0xfd   :  { %1226 = vmatmul.mubr.f32.vlgmr.msra.gmra.mrb[0].mxu1 %v153_v26  ;;  %v460_v26 = vld [vmem:[%s2252_s10 + $0xa0] sm:$0xff]  ;;  %v493_v32 = vsel %vm488_vm8, 1.0, %v1515_v12  ;;  %v483_v36 = vpop.permute.xlu1 %482 }
  0xfe   :  { %1265 = vmatprep.mubr.msk.f32.mxu1 %vm1514_vm0, %v1515_v12  ;;  %v1368_v29 = vpack.c.bf16 %v461_v27, %v460_v26  ;;  %vm490_vm10 = vcmp.eq.s32.totalorder %v1855_v4, %v483_v36  ;;  %v1394_v26 = vpack.c.bf16 %v695_v25, %v693_v24  ;;  %v698_v27 = vld [vmem:[%s2253_s11 + $0x28] sm:$0xff]  ;;  %v701_v36 = vld [vmem:[%s2253_s11 + $0x40] sm:$0xff] }
  0xff   :  { %v486_v38 = vpop.permute.xlu0 %485  ;;  %v495_v44 = vsel %vm490_vm10, 1.0, %v1515_v12 }
 0x100   :  { %vm491_vm11 = vcmp.eq.s32.totalorder %v1855_v4, %v486_v38 }
 0x101   :  { %v367_v52 = vpop.permute.xlu1 %366 }
 0x102   :  { %vm381_vm13 = vcmp.eq.s32.totalorder %v1930_v7, %v367_v52  ;;  %vm380_vm15 = vcmp.eq.s32.totalorder %v1855_v4, %v367_v52  ;;  %v1410_v52 = vpack.c.bf16 %v711_v49, %v709_v47 }
 0x103   :  { %v402_v51 = vpop.permute.xlu0 %401 }
 0x104   :  { %vm415_vm12 = vcmp.eq.s32.totalorder %v402_v51, 1  ;;  %v716_v51 = vld [vmem:[%s2253_s11 + $0xb8] sm:$0xff] }
 0x105   :  { %vm421_vm14 = vmand %vm381_vm13, %vm415_vm12  ;;  %v370_v8 = vpop.permute.xlu1 %369 }
 0x106   :  { %vm383_vm1 = vcmp.eq.s32.totalorder %v1930_v7, %v370_v8  ;;  %vm420_vm2 = vmand %vm380_vm15, %vm415_vm12  ;;  %vm382_vm3 = vcmp.eq.s32.totalorder %v1855_v4, %v370_v8 }
 0x107   :  { %v405_v6 = vpop.permute.xlu0 %404 }
 0x1d0   :  { %v245_v59 = vpop.f32.mrb[0].mxu1 }
 0x1d1   :  { %v246_v60 = vadd.f32 %v1049_v58, %v245_v59  ;;  %v1227_v61 = vpop.f32.mrb[1].mxu1  ;;  %v496_v58 = vsel %vm491_vm11, 1.0, %v1515_v12  ;;  %v468_v59 = vld [vmem:[%s2252_s10 + $0xe0] sm:$0xff] }
 0x1d2   :  { %v1517_v61 = vmov 1.0  }
 0x1d3   :  { %v250_v62 = vmul.f32 0.70710677, %v246_v60  ;;  %v249_v0 = vmul.f32 0.5, %v246_v60  ;;  %v469_v60 = vld [vmem:[%s2252_s10 + $0xe8] sm:$0xff] }
 0x1d5   :  { %1455 = verf.f32 %v250_v62  ;;  %v1382_v62 = vpack.c.bf16 %v451_v56, %v450_v55  ;;  %v715_v55 = vld [vmem:[%s2253_s11 + $0xb0] sm:$0xff]  ;;  %v718_v56 = vld [vmem:[%s2253_s11 + $0xc8] sm:$0xff] }
 0x1df   :  { %v1456_v63 = vpop.eup %1455 }
 0x1e0   :  { %v252_v1 = vadd.f32 1.0, %v1456_v63  ;;  %v1384_v63 = vpack.c.bf16 %v469_v60, %v468_v59 }
 0x1e2   :  { %v253_v2 = vmul.f32 %v252_v1, %v249_v0  ;;  %v452_v0 = vld [vmem:[%s2252_s10 + $0x60] sm:$0xff]  ;;  %v453_v1 = vld [vmem:[%s2252_s10 + $0x68] sm:$0xff] }
 0x1e4   :  { %1261 = vmatmul.mubr.f32.vlgmr.msra.gmra.mrb[2].mxu0 %v253_v2  ;;  %v470_v2 = vld [vmem:[%s2252_s10 + $0xf0] sm:$0xff] }
 0x1e5   :  { %801 = vmatprep.mubr.f32.mxu0 %v1515_v12  ;;  %v1388_v10 = vpack.c.bf16 %v471_v5, %v470_v2  ;;  %v721_v5 = vld [vmem:[%s2253_s11 + $0xe0] sm:$0xff] }
 0x2b7   :  { %v343_v15 = vpop.f32.mrb[2].mxu0 }
 0x2b8   :  { %v344_v18 = vadd.f32 %v1050_v9, %v343_v15  ;;  %v1262_v19 = vpop.f32.mrb[3].mxu0  ;;  %v1386_v9 = vpack.c.bf16 %v453_v1, %v452_v0  ;;  %v408_v15 = vpop.permute.xlu0 %407  ;;  %v722_v0 = vld [vmem:[%s2253_s11 + $0xe8] sm:$0xff]  ;;  %v724_v1 = vld [vmem:[%s2253_s11 + $0xf8] sm:$0xff] }
 0x2b9   :  { %vm417_vm5 = vcmp.eq.s32.totalorder %v408_v15, 1  ;;  %v1420_v2 = vpack.c.bf16 %v724_v1, %v722_v0 }
 0x2ba   :  { %1264 = vmatpush3.msra.mxu1 %v344_v18 }
 0x2bb   :  { %1266 = vmatmul.mubr.msk.f32.vlgmr.msra.gmra.mrb[2].mxu1 %vm497_vm7, %v492_v17  ;;  %1361 = vmatprep.subr.bf16.mxu1 %v1360_v16  ;;  %v373_v16 = vpop.permute.xlu1 %372 }
 0x2bc   :  { %1363 = vmatpush3.bf16.msra.mxu1 %v1362_v20  ;;  %1268 = vmatprep.mubr.msk.f32.mxu1 %vm1514_vm0, %v1515_v12  ;;  %v411_v17 = vpop.permute.xlu0 %410  ;;  %vm385_vm6 = vcmp.eq.s32.totalorder %v1930_v7, %v373_v16  ;;  %vm384_vm8 = vcmp.eq.s32.totalorder %v1855_v4, %v373_v16 }
 0x2bd   :  { %1365 = vmatprep.subr.bf16.mxu1 %v1364_v21  ;;  %vm425_vm9 = vmand %vm385_vm6, %vm417_vm5  ;;  %vm418_vm10 = vcmp.eq.s32.totalorder %v411_v17, 1  ;;  %v694_v21 = vld [vmem:[%s2253_s11 + $0x8] sm:$0xff] }
 0x2be   :  { %vm424_vm12 = vmand %vm384_vm8, %vm417_vm5  ;;  %v1392_v23 = vpack.c.bf16 %v696_v22, %v694_v21 }
 0x2bf   :  { %1269 = vmatmul.mubr.msk.f32.gmra.mrb[4].mxu1 %vm497_vm7, %v493_v32  ;;  %v376_v18 = vpop.permute.xlu1 %375 }
 0x2c0   :  { %1367 = vmatpush3.bf16.msra.mxu1 %v1366_v28  ;;  %1271 = vmatprep.mubr.msk.f32.mxu1 %vm1514_vm0, %v1515_v12  ;;  %vm387_vm11 = vcmp.eq.s32.totalorder %v1930_v7, %v376_v18  ;;  %v414_v19 = vpop.permute.xlu0 %413  ;;  %vm386_vm13 = vcmp.eq.s32.totalorder %v1855_v4, %v376_v18  ;;  %v700_v28 = vld [vmem:[%s2253_s11 + $0x38] sm:$0xff] }
 0x2c1   :  { %1369 = vmatprep.subr.bf16.mxu1 %v1368_v29  ;;  %vm419_vm15 = vcmp.eq.s32.totalorder %v414_v19, 1  ;;  %v697_v29 = vld [vmem:[%s2253_s11 + $0x20] sm:$0xff]  ;;  %1393 = vmatprep.subr.bf16.mxu0 %v1392_v23  ;;  %v1396_v30 = vpack.c.bf16 %v700_v28, %v698_v27 }
 0x2c2   :  { %1395 = vmatpush1.bf16.msra.mxu0 %v1394_v26  ;;  %v1398_v32 = vpack.c.bf16 %v699_v31, %v697_v29 }
 0x2c3   :  { %1272 = vmatmul.mubr.msk.f32.gmra.mrb[6].mxu1 %vm497_vm7, %v494_v35  ;;  %v379_v20 = vpop.permute.xlu1 %378  ;;  %1397 = vmatprep.subr.bf16.mxu0 %v1396_v30  ;;  %v1400_v35 = vpack.c.bf16 %v704_v34, %v702_v33 }
 0x2c4   :  { %1371 = vmatpush3.bf16.msra.mxu1 %v1370_v37  ;;  %1274 = vmatprep.mubr.msk.f32.mxu1 %vm1514_vm0, %v1515_v12  ;;  %v703_v37 = vld [vmem:[%s2253_s11 + $0x50] sm:$0xff] }
 0x2c5   :  { %1373 = vmatprep.subr.bf16.mxu1 %v1372_v39  ;;  %v1402_v38 = vpack.c.bf16 %v703_v37, %v701_v36  ;;  %v706_v39 = vld [vmem:[%s2253_s11 + $0x68] sm:$0xff] }
 0x2c6   :  { %1399 = vmatpush1.bf16.msra.mxu0 %v1398_v32  ;;  %v1404_v41 = vpack.c.bf16 %v708_v40, %v706_v39  ;;  %v728_v40 = vshrl.u32 %v362_v3, 7 }
 0x2c7   :  { %1275 = vmatmul.mubr.msk.f32.gmra.mrb[8].mxu1 %vm497_vm7, %v495_v44  ;;  %1401 = vmatprep.subr.bf16.mxu0 %v1400_v35  ;;  %v1406_v44 = vpack.c.bf16 %v707_v43, %v705_v42  ;;  %v725_v42 = vld [vmem:[%s2254_s12] sm:$0x3] }
 0x2c8   :  { %1375 = vmatpush3.bf16.msra.mxu1 %v1374_v45  ;;  %1277 = vmatprep.mubr.msk.f32.mxu1 %vm1514_vm0, %v1515_v12  ;;  %vm416_vm0 = vcmp.eq.s32.totalorder %v405_v6, 1  ;;  %v710_v45 = vld [vmem:[%s2253_s11 + $0x88] sm:$0xff]  ;;  %v723_v6 = vld [vmem:[%s2253_s11 + $0xf0] sm:$0xff]  ;;  %v733_v43 = vsub.s32 1, %v728_v40 }
 0x2c9   :  { %1377 = vmatprep.subr.bf16.mxu1 %v1376_v46  ;;  %vm423_vm4 = vmand %vm383_vm1, %vm416_vm0  ;;  %vm389_vm1 = vcmp.eq.s32.totalorder %v1930_v7, %v379_v20  ;;  %v712_v46 = vld [vmem:[%s2253_s11 + $0x98] sm:$0xff]  ;;  %v1422_v8 = vpack.c.bf16 %v723_v6, %v721_v5 }
 0x2ca   :  { %1403 = vmatpush1.bf16.msra.mxu0 %v1402_v38  ;;  %v1408_v48 = vpack.c.bf16 %v712_v46, %v710_v45  ;;  %v734_v45 = vrot.slane %v725_v42, %v733_v43 }
 0x2cb   :  { %1278 = vmatmul.mubr.msk.f32.gmra.mrb[10].mxu1 %vm497_vm7, %v496_v58  ;;  %vm422_vm7 = vmand %vm382_vm3, %vm416_vm0  ;;  %1405 = vmatprep.subr.bf16.mxu0 %v1404_v41  ;;  %v720_v58 = vld [vmem:[%s2253_s11 + $0xd8] sm:$0xff] }
 0x2cc   :  { %1379 = vmatpush3.bf16.msra.mxu1 %v1378_v53  ;;  %1056 = vmatprep.mubr.msk.f32.mxu1 %vm421_vm14, %v1517_v61  ;;  %vm427_vm14 = vmand %vm387_vm11, %vm418_vm10  ;;  %v1412_v53 = vpack.c.bf16 %v716_v51, %v714_v50  ;;  %v1416_v60 = vpack.c.bf16 %v720_v58, %v718_v56 }
 0x2cd   :  { %1381 = vmatprep.subr.bf16.mxu1 %v1380_v54  ;;  %vm426_vm0 = vmand %vm386_vm13, %vm418_vm10  ;;  %v713_v54 = vld [vmem:[%s2253_s11 + $0xa0] sm:$0xff] }
 0x2ce   :  { %vm429_vm3 = vmand %vm389_vm1, %vm419_vm15  ;;  %1407 = vmatpush1.bf16.msra.mxu0 %v1406_v44  ;;  %v1414_v59 = vpack.c.bf16 %v715_v55, %v713_v54  ;;  %vm957_vm1 = vcmp.ne.s32.totalorder %v1847_v57, 4294967196 }
 0x2cf   :  { %1409 = vmatprep.subr.bf16.mxu0 %v1408_v48 }
 0x2d0   :  { %1383 = vmatpush3.bf16.msra.mxu1 %v1382_v62  ;;  %v719_v62 = vld [vmem:[%s2253_s11 + $0xd0] sm:$0xff] }
 0x2d1   :  { %1385 = vmatprep.subr.bf16.mxu1 %v1384_v63 }
 0x2d2   :  { %1411 = vmatpush1.bf16.msra.mxu0 %v1410_v52 }
 0x2d3   :  { %1413 = vmatprep.subr.bf16.mxu0 %v1412_v53 }
 0x2d4   :  { %1387 = vmatpush3.bf16.msra.mxu1 %v1386_v9 }
 0x2d5   :  { %1389 = vmatprep.subr.bf16.mxu1 %v1388_v10 }
 0x2d6   :  { %1415 = vmatpush1.bf16.msra.mxu0 %v1414_v59 }
 0x2d7   :  { %1417 = vmatprep.subr.bf16.mxu0 %v1416_v60 }
 0x2d8   :  { %1391 = vmatpush3.bf16.msra.mxu1 %v1390_v14 }
 0x2d9   :  { %1424 = vmatprep.subr.bf16.mxu1 %v1392_v23 }
 0x2db   :  { %1057 = vmatmul.mubr.msk.f32.vlgmr.msra.gmra.mrb[12].mxu1 %vm420_vm2, %v1517_v61  ;;  %vm388_vm2 = vcmp.eq.s32.totalorder %v1855_v4, %v379_v20 }
 0x2dc   :  { %1058 = vmatprep.mubr.msk.f32.mxu1 %vm423_vm4, %v1517_v61  ;;  %vm428_vm4 = vmand %vm388_vm2, %vm419_vm15  ;;  %1432 = vmatpush1.bf16.msra.mxu1 %v1394_v26  ;;  %vm982_vm2 = vcmask 7168  }
 0x2dd   :  { %1425 = vmatprep.subr.bf16.mxu1 %v1396_v30 }
 0x2df   :  { %1059 = vmatmul.mubr.msk.f32.gmra.mrb[14].mxu1 %vm422_vm7, %v1517_v61 }
 0x2e0   :  { %1060 = vmatprep.mubr.msk.f32.mxu1 %vm425_vm9, %v1517_v61  ;;  %1433 = vmatpush1.bf16.msra.mxu1 %v1398_v32 }
 0x2e1   :  { %1426 = vmatprep.subr.bf16.mxu1 %v1400_v35 }
 0x2e3   :  { %1061 = vmatmul.mubr.msk.f32.gmra.mrb[16].mxu1 %vm424_vm12, %v1517_v61 }
 0x2e4   :  { %1062 = vmatprep.mubr.msk.f32.mxu1 %vm427_vm14, %v1517_v61  ;;  %1434 = vmatpush1.bf16.msra.mxu1 %v1402_v38 }
 0x2e5   :  { %1427 = vmatprep.subr.bf16.mxu1 %v1404_v41  ;;  %v729_v41 = vsub.s32 0, %v728_v40 }
 0x2e7   :  { %1063 = vmatmul.mubr.msk.f32.gmra.mrb[18].mxu1 %vm426_vm0, %v1517_v61 }
 0x2e8   :  { %1064 = vmatprep.mubr.msk.f32.mxu1 %vm429_vm3, %v1517_v61  ;;  %1435 = vmatpush1.bf16.msra.mxu1 %v1406_v44  ;;  %v730_v44 = vrot.slane %v725_v42, %v729_v41 }
 0x2e9   :  { %1428 = vmatprep.subr.bf16.mxu1 %v1408_v48 }
 0x2eb   :  { %1065 = vmatmul.mubr.msk.f32.gmra.mrb[20].mxu1 %vm428_vm4, %v1517_v61  ;;  %v717_v61 = vld [vmem:[%s2253_s11 + $0xc0] sm:$0xff] }
 0x2ec   :  { %819 = vmatprep.mubr.f32.mxu1 %v1515_v12  ;;  %1436 = vmatpush1.bf16.msra.mxu1 %v1410_v52  ;;  %v1418_v63 = vpack.c.bf16 %v719_v62, %v717_v61 }
 0x2ed   :  { %1429 = vmatprep.subr.bf16.mxu1 %v1412_v53 }
 0x2ee   :  { %1419 = vmatpush1.bf16.msra.mxu0 %v1418_v63 }
 0x2ef   :  { %1421 = vmatprep.subr.bf16.mxu0 %v1420_v2 }
 0x2f0   :  { %1437 = vmatpush1.bf16.msra.mxu1 %v1414_v59 }
 0x2f1   :  { %1430 = vmatprep.subr.bf16.mxu1 %v1416_v60 }
 0x2f2   :  { %1423 = vmatpush1.bf16.msra.mxu0 %v1422_v8 }
 0x2f4   :  { %1438 = vmatpush1.bf16.msra.mxu1 %v1418_v63 }
 0x2f5   :  { %1431 = vmatprep.subr.bf16.mxu1 %v1420_v2 }
 0x2f8   :  { %1439 = vmatpush1.bf16.msra.mxu1 %v1422_v8 }
 0x38e   :  { %v579_v9 = vpop.f32.mrb[2].mxu1 }
 0x38f   :  { %v1267_v10 = vpop.f32.mrb[3].mxu1 }
 0x390   :  { %v2131_v10 = vld [vmem:[%s2245_s3 + $0x10] sm:$0xff] }
 0x391   :  { %vm959_vm0 = vcmp.ne.s32.totalorder %v2131_v10, 4294967196 }
 0x392   :  { %v584_v11 = vpop.f32.mrb[4].mxu1 }
 0x393   :  { %v1270_v13 = vpop.f32.mrb[5].mxu1 }
 0x394   :  { %v2143_v13 = vld [vmem:[%s2245_s3 + $0x8] sm:$0xff] }
 0x395   :  { %vm958_vm15 = vcmp.ne.s32.totalorder %v2143_v13, 4294967196 }
 0x396   :  { %v589_v14 = vpop.f32.mrb[6].mxu1 }
 0x397   :  { %v1273_v15 = vpop.f32.mrb[7].mxu1 }
 0x398   :  { %v909_v15 = vpop.permute.xlu1 %908 }
 0x399   :  { %vm922_vm5 = vcmp.eq.s32.totalorder %v1855_v4, %v909_v15  ;;  %vm923_vm6 = vcmp.eq.s32.totalorder %v1930_v7, %v909_v15 }
 0x39a   :  { %v594_v16 = vpop.f32.mrb[8].mxu1 }
 0x39b   :  { %v1276_v17 = vpop.f32.mrb[9].mxu1 }
 0x39e   :  { %v599_v18 = vpop.f32.mrb[10].mxu1 }
 0x39f   :  { %v1279_v19 = vpop.f32.mrb[11].mxu1 }
 0x3ae   :  { %v1178_v20 = vpop.f32.mrb[12].mxu1 }
 0x3af   :  { %v1179_v21 = vpop.f32.mrb[13].mxu1 }
 0x3b0   :  { %v1180_v22 = vadd.f32 %v1179_v21, %v1178_v20 }
 0x3b2   :  { %v670_v23 = vadd.f32 %v1180_v22, %v579_v9  ;;  %v1181_v24 = vpop.f32.mrb[14].mxu1 }
 0x3b3   :  { %v1182_v25 = vpop.f32.mrb[15].mxu1 }
 0x3b4   :  { %v1183_v26 = vadd.f32 %v1182_v25, %v1181_v24  ;;  %802 = vmatmul.mubr.f32.vlgmr.msra.gmra.mrb[4].mxu0 %v670_v23 }
 0x3b5   :  { %807 = vmatprep.mubr.f32.mxu0 %v1515_v12 }
 0x3b6   :  { %v675_v27 = vadd.f32 %v1183_v26, %v584_v11  ;;  %v1184_v28 = vpop.f32.mrb[16].mxu1  ;;  %v2137_v11 = vld [vmem:[%s2245_s3 + $0x18] sm:$0xff] }
 0x3b7   :  { %v1185_v29 = vpop.f32.mrb[17].mxu1  ;;  %vm960_vm3 = vcmp.ne.s32.totalorder %v2137_v11, 4294967196 }
 0x3b8   :  { %v1186_v30 = vadd.f32 %v1185_v29, %v1184_v28  ;;  %808 = vmatmul.mubr.f32.gmra.mrb[6].mxu0 %v675_v27 }
 0x3b9   :  { %813 = vmatprep.mubr.f32.mxu0 %v1515_v12 }
 0x3ba   :  { %v680_v31 = vadd.f32 %v1186_v30, %v589_v14  ;;  %v1187_v32 = vpop.f32.mrb[18].mxu1  ;;  %v2149_v14 = vld [vmem:[%s2245_s3 + $0x20] sm:$0xff] }
 0x3bb   :  { %v1188_v33 = vpop.f32.mrb[19].mxu1  ;;  %vm961_vm4 = vcmp.ne.s32.totalorder %v2149_v14, 4294967196 }
 0x3bc   :  { %v1189_v34 = vadd.f32 %v1188_v33, %v1187_v32  ;;  %814 = vmatmul.mubr.f32.gmra.mrb[8].mxu0 %v680_v31 }
 0x3be   :  { %v685_v35 = vadd.f32 %v1189_v34, %v594_v16  ;;  %v1190_v36 = vpop.f32.mrb[20].mxu1 }
 0x3bf   :  { %v1191_v37 = vpop.f32.mrb[21].mxu1 }
 0x3c0   :  { %v1192_v38 = vadd.f32 %v1191_v37, %v1190_v36  ;;  %820 = vmatmul.mubr.f32.vlgmr.msra.gmra.mrb[22].mxu1 %v685_v35 }
 0x3c1   :  { %825 = vmatprep.mubr.f32.mxu1 %v1515_v12 }
 0x3c2   :  { %v690_v39 = vadd.f32 %v1192_v38, %v599_v18 }
 0x3c4   :  { %826 = vmatmul.mubr.f32.gmra.mrb[24].mxu1 %v690_v39 }
 0x487   :  { %v803_v46 = vpop.f32.mrb[4].mxu0 }
 0x488   :  { %v2098_v47 = vadd.f32 %v803_v46, %v730_v44  ;;  %v805_v48 = vpop.f32.mrb[5].mxu0 }
 0x489   :  { %v2100_v49 = vadd.f32 %v805_v48, %v734_v45 }
 0x48b   :  { %v809_v50 = vpop.f32.mrb[6].mxu0  ;;  %v832_v51 = vmax.f32 %v2098_v47, %v2100_v49 }
 0x48c   :  { %v2104_v52 = vadd.f32 %v809_v50, %v730_v44  ;;  %v811_v3 = vpop.f32.mrb[7].mxu0 }
 0x48d   :  { %v2106_v53 = vadd.f32 %v811_v3, %v734_v45  ;;  %833 = vmax.xlane.f32.xlu1 %v832_v51 }
 0x48f   :  { %v815_v54 = vpop.f32.mrb[8].mxu0  ;;  %v835_v55 = vmax.f32 %v2104_v52, %v2106_v53 }
 0x490   :  { %v2110_v56 = vadd.f32 %v815_v54, %v730_v44  ;;  %v817_v58 = vpop.f32.mrb[9].mxu0 }
 0x491   :  { %v2112_v59 = vadd.f32 %v817_v58, %v734_v45  ;;  %836 = vmax.xlane.f32.xlu0 %v835_v55 }
 0x493   :  { %v821_v60 = vpop.f32.mrb[22].mxu1  ;;  %v838_v61 = vmax.f32 %v2110_v56, %v2112_v59 }
 0x494   :  { %v2116_v62 = vadd.f32 %v821_v60, %v730_v44  ;;  %v823_v63 = vpop.f32.mrb[23].mxu1 }
 0x495   :  { %v2118_v0 = vadd.f32 %v823_v63, %v734_v45  ;;  %839 = vmax.xlane.f32.xlu0 %v838_v61  ;;  %v932_v61 = vsel %vm922_vm5, %v2098_v47, 0.0  ;;  %v933_v63 = vsel %vm923_vm6, %v2100_v49, 0.0  ;;  %vm1026_vm5 = vcmp.eq.s32.totalorder %v1855_v4, 2 }
 0x496   :  { %v942_v15 = vadd.f32 %v933_v63, %v932_v61  ;;  %vm1025_vm6 = vcmp.eq.s32.totalorder %v1855_v4, 1 }
 0x497   :  { %v827_v1 = vpop.f32.mrb[24].mxu1  ;;  %v841_v2 = vmax.f32 %v2116_v62, %v2118_v0 }
 0x498   :  { %v2122_v5 = vadd.f32 %v827_v1, %v730_v44  ;;  %v829_v6 = vpop.f32.mrb[25].mxu1 }
 0x499   :  { %v2124_v8 = vadd.f32 %v829_v6, %v734_v45  ;;  %842 = vmax.xlane.f32.xlu1 %v841_v2 }
 0x49b   :  { %v844_v9 = vmax.f32 %v2122_v5, %v2124_v8 }
 0x49d   :  { %845 = vmax.xlane.f32.xlu0 %v844_v9 }
 0x4aa   :  { %914 = vperm.xlu1 %1454, %v2131_v10   ;;  %v1069_v10 = vsel %vm960_vm3, 1.0, %v1515_v12 }
 0x4ae   :  { %917 = vperm.xlu1 %1454, %v2137_v11  }
 0x4b3   :  { %911 = vperm.xlu0 %1453, %v2143_v13  }
 0x4b7   :  { %920 = vperm.xlu0 %1453, %v2149_v14  }
 0x51a   :  { %v2152_v16 = vpop.xlane.xlu1 %833 }
 0x51b   :  { %v847_v17 = vsub.f32 %v2098_v47, %v2152_v16  ;;  %v848_v18 = vsub.f32 %v2100_v49, %v2152_v16 }
 0x51d   :  { %v857_v19 = vmul.f32 1.442695, %v847_v17  ;;  %v859_v20 = vmul.f32 1.442695, %v848_v18 }
 0x51e   :  { %v2158_v21 = vpop.xlane.xlu0 %836 }
 0x51f   :  { %1457 = vpow2.f32 %v857_v19  ;;  %v849_v22 = vsub.f32 %v2104_v52, %v2158_v21  ;;  %v850_v23 = vsub.f32 %v2106_v53, %v2158_v21 }
 0x520   :  { %1459 = vpow2.f32 %v859_v20 }
 0x521   :  { %v861_v24 = vmul.f32 1.442695, %v849_v22  ;;  %v863_v25 = vmul.f32 1.442695, %v850_v23 }
 0x522   :  { %v2164_v26 = vpop.xlane.xlu0 %839 }
 0x523   :  { %1461 = vpow2.f32 %v861_v24  ;;  %v851_v27 = vsub.f32 %v2110_v56, %v2164_v26  ;;  %v852_v28 = vsub.f32 %v2112_v59, %v2164_v26 }
 0x524   :  { %1463 = vpow2.f32 %v863_v25  ;;  %v1068_v25 = vsel %vm959_vm0, 1.0, %v1515_v12 }
 0x525   :  { %v865_v29 = vmul.f32 1.442695, %v851_v27  ;;  %v867_v30 = vmul.f32 1.442695, %v852_v28  ;;  %v1004_v57 = vsel %vm982_vm2, %v1068_v25, 0.0  ;;  %v1006_v27 = vsel %vm982_vm2, %v1069_v10, 0.0 }
 0x526   :  { %v2170_v31 = vpop.xlane.xlu1 %842  ;;  %v1070_v28 = vsel %vm961_vm4, 1.0, %v1515_v12 }
 0x527   :  { %1465 = vpow2.f32 %v865_v29  ;;  %v853_v32 = vsub.f32 %v2116_v62, %v2170_v31  ;;  %v854_v33 = vsub.f32 %v2118_v0, %v2170_v31  ;;  %v1008_v11 = vsel %vm982_vm2, %v1070_v28, 0.0 }
 0x528   :  { %1467 = vpow2.f32 %v867_v30 }
 0x529   :  { %v1458_v34 = vpop.eup %1457  ;;  %v869_v35 = vmul.f32 1.442695, %v853_v32  ;;  %v871_v36 = vmul.f32 1.442695, %v854_v33 }
 0x52a   :  { %v1460_v37 = vpop.eup %1459  ;;  %v2176_v38 = vpop.xlane.xlu0 %845 }
 0x52b   :  { %1469 = vpow2.f32 %v869_v35  ;;  %v855_v39 = vsub.f32 %v2122_v5, %v2176_v38  ;;  %v856_v40 = vsub.f32 %v2124_v8, %v2176_v38  ;;  %v877_v41 = vadd.f32 %v1460_v37, %v1458_v34  ;;  %v915_v51 = vpop.permute.xlu1 %914 }
 0x52c   :  { %1471 = vpow2.f32 %v871_v36  ;;  %vm926_vm7 = vcmp.eq.s32.totalorder %v1855_v4, %v915_v51  ;;  %vm927_vm8 = vcmp.eq.s32.totalorder %v1930_v7, %v915_v51 }
 0x52d   :  { %v1462_v42 = vpop.eup %1461  ;;  %v873_v43 = vmul.f32 1.442695, %v855_v39  ;;  %v875_v44 = vmul.f32 1.442695, %v856_v40  ;;  %878 = vadd.xlane.f32.xlu1 %v877_v41  ;;  %v936_v18 = vsel %vm926_vm7, %v2110_v56, 0.0  ;;  %v937_v19 = vsel %vm927_vm8, %v2112_v59, 0.0 }
 0x52e   :  { %v1464_v45 = vpop.eup %1463  ;;  %v948_v22 = vadd.f32 %v937_v19, %v936_v18  ;;  %vm1024_vm7 = vcmp.eq.s32.totalorder %v1855_v4, 0 }
 0x52f   :  { %1473 = vpow2.f32 %v873_v43  ;;  %v880_v46 = vadd.f32 %v1464_v45, %v1462_v42  ;;  %v918_v2 = vpop.permute.xlu1 %917 }
 0x530   :  { %1475 = vpow2.f32 %v875_v44  ;;  %vm928_vm11 = vcmp.eq.s32.totalorder %v1855_v4, %v918_v2  ;;  %vm929_vm12 = vcmp.eq.s32.totalorder %v1930_v7, %v918_v2 }
 0x531   :  { %v1466_v48 = vpop.eup %1465  ;;  %881 = vadd.xlane.f32.xlu0 %v880_v46 }
 0x532   :  { %v1468_v50 = vpop.eup %1467  ;;  %v912_v54 = vpop.permute.xlu0 %911 }
 0x533   :  { %v883_v3 = vadd.f32 %v1468_v50, %v1466_v48  ;;  %vm924_vm9 = vcmp.eq.s32.totalorder %v1855_v4, %v912_v54  ;;  %vm925_vm10 = vcmp.eq.s32.totalorder %v1930_v7, %v912_v54 }
 0x534   :  { %v934_v47 = vsel %vm924_vm9, %v2104_v52, 0.0  ;;  %v935_v49 = vsel %vm925_vm10, %v2106_v53, 0.0  ;;  %v938_v52 = vsel %vm928_vm11, %v2116_v62, 0.0  ;;  %v939_v53 = vsel %vm929_vm12, %v2118_v0, 0.0 }
 0x535   :  { %v1470_v55 = vpop.eup %1469  ;;  %884 = vadd.xlane.f32.xlu0 %v883_v3  ;;  %v945_v20 = vadd.f32 %v935_v49, %v934_v47  ;;  %v951_v24 = vadd.f32 %v939_v53, %v938_v52 }
 0x536   :  { %v1472_v58 = vpop.eup %1471  ;;  %v921_v9 = vpop.permute.xlu0 %920 }
 0x537   :  { %v886_v60 = vadd.f32 %v1472_v58, %v1470_v55  ;;  %vm930_vm13 = vcmp.eq.s32.totalorder %v1855_v4, %v921_v9  ;;  %vm931_vm14 = vcmp.eq.s32.totalorder %v1930_v7, %v921_v9  ;;  %v1067_v7 = vsel %vm958_vm15, 1.0, %v1515_v12 }
 0x538   :  { %v940_v56 = vsel %vm930_vm13, %v2122_v5, 0.0  ;;  %v941_v23 = vsel %vm931_vm14, %v2124_v8, 0.0  ;;  %v1066_v5 = vsel %vm957_vm1, 1.0, %v1515_v12  ;;  %v1002_v0 = vsel %vm982_vm2, %v1067_v7, 0.0 }
 0x539   :  { %v1474_v1 = vpop.eup %1473  ;;  %887 = vadd.xlane.f32.xlu1 %v886_v60  ;;  %v954_v59 = vadd.f32 %v941_v23, %v940_v56  ;;  %v1001_v62 = vsel %vm982_vm2, %v1066_v5, 0.0 }
 0x53a   :  { %v1476_v6 = vpop.eup %1475  ;;  %v1003_v8 = vadd.f32 %v1002_v0, %v1001_v62 }
 0x53b   :  { %v889_v17 = vadd.f32 %v1476_v6, %v1474_v1 }
 0x53c   :  { %v1005_v13 = vadd.f32 %v1004_v57, %v1003_v8 }
 0x53d   :  { %890 = vadd.xlane.f32.xlu0 %v889_v17  ;;  %943 = vadd.xlane.f32.xlu1 %v942_v15 }
 0x53e   :  { %v1007_v29 = vadd.f32 %v1006_v27, %v1005_v13 }
 0x540   :  { %v1009_v30 = vadd.f32 %v1008_v11, %v1007_v29 }
 0x541   :  { %946 = vadd.xlane.f32.xlu0 %v945_v20  ;;  %949 = vadd.xlane.f32.xlu1 %v948_v22 }
 0x545   :  { %955 = vadd.xlane.f32.xlu1 %v954_v59  ;;  %952 = vadd.xlane.f32.xlu0 %v951_v24 }
 0x549   :  { %1010 = vadd.xlane.f32.xlu1 %v1009_v30 }
 0x5ba   :  { %v879_v32 = vpop.xlane.xlu1 %878 }
 0x5bb   :  { %1477 = vlog2.f32 %v879_v32 }
 0x5be   :  { %v882_v33 = vpop.xlane.xlu0 %881 }
 0x5bf   :  { %1479 = vlog2.f32 %v882_v33 }
 0x5c2   :  { %v885_v34 = vpop.xlane.xlu0 %884 }
 0x5c3   :  { %1481 = vlog2.f32 %v885_v34 }
 0x5c5   :  { %v1478_v14 = vpop.eup %1477 }
 0x5c6   :  { %v888_v35 = vpop.xlane.xlu1 %887  ;;  %v893_v36 = vmul.f32 0.6931472, %v1478_v14 }
 0x5c7   :  { %1483 = vlog2.f32 %v888_v35 }
 0x5c8   :  { %v902_v12 = vadd.f32 %v893_v36, %v2152_v16 }
 0x5c9   :  { %v1480_v37 = vpop.eup %1479 }
 0x5ca   :  { %v895_v39 = vmul.f32 0.6931472, %v1480_v37  ;;  %v891_v40 = vpop.xlane.xlu0 %890  ;;  %v944_v41 = vpop.xlane.xlu1 %943 }
 0x5cb   :  { %1485 = vlog2.f32 %v891_v40  ;;  %v972_v45 = vsub.f32 %v902_v12, %v944_v41 }
 0x5cc   :  { %v903_v42 = vadd.f32 %v895_v39, %v2158_v21 }
 0x5cd   :  { %v1482_v43 = vpop.eup %1481  ;;  %v977_v58 = vmul.f32 %v1066_v5, %v972_v45 }
 0x5ce   :  { %v897_v44 = vmul.f32 0.6931472, %v1482_v43  ;;  %v947_v46 = vpop.xlane.xlu0 %946  ;;  %v950_v54 = vpop.xlane.xlu1 %949 }
 0x5cf   :  { %v973_v48 = vsub.f32 %v903_v42, %v947_v46  ;;  %v983_v6 = vsel %vm982_vm2, %v977_v58, 0.0 }
 0x5d0   :  { %v904_v50 = vadd.f32 %v897_v44, %v2164_v26 }
 0x5d1   :  { %v1484_v51 = vpop.eup %1483  ;;  %v978_v3 = vmul.f32 %v1067_v7, %v973_v48 }
 0x5d2   :  { %v899_v55 = vmul.f32 0.6931472, %v1484_v51  ;;  %v974_v60 = vsub.f32 %v904_v50, %v950_v54  ;;  %v953_v21 = vpop.xlane.xlu0 %952  ;;  %v956_v47 = vpop.xlane.xlu1 %955 }
 0x5d3   :  { %v984_v61 = vsel %vm982_vm2, %v978_v3, 0.0 }
 0x5d4   :  { %v979_v16 = vmul.f32 %v1068_v25, %v974_v60  ;;  %v905_v63 = vadd.f32 %v899_v55, %v2170_v31  ;;  %v985_v17 = vadd.f32 %v984_v61, %v983_v6 }
 0x5d5   :  { %v1486_v1 = vpop.eup %1485 }
 0x5d6   :  { %v901_v2 = vmul.f32 0.6931472, %v1486_v1  ;;  %v975_v9 = vsub.f32 %v905_v63, %v953_v21  ;;  %v986_v26 = vsel %vm982_vm2, %v979_v16, 0.0  ;;  %v1011_v52 = vpop.xlane.xlu1 %1010 }
 0x5d7   :  { %v987_v20 = vadd.f32 %v986_v26, %v985_v17  ;;  %v1012_v53 = vrot.slane %v1011_v52, 4 }
 0x5d8   :  { %v980_v15 = vmul.f32 %v1069_v10, %v975_v9  ;;  %v906_v18 = vadd.f32 %v901_v2, %v2176_v38 }
 0x5d9   :  { %v1013_v59 = vadd.f32 %v1012_v53, %v1011_v52 }
 0x5da   :  { %v976_v49 = vsub.f32 %v906_v18, %v956_v47  ;;  %v988_v19 = vsel %vm982_vm2, %v980_v15, 0.0 }
 0x5db   :  { %v989_v56 = vadd.f32 %v988_v19, %v987_v20  ;;  %v1014_v24 = vrot.slane %v1013_v59, 2 }
 0x5dc   :  { %v981_v22 = vmul.f32 %v1070_v28, %v976_v49 }
 0x5dd   :  { %v1015_v0 = vadd.f32 %v1014_v24, %v1013_v59 }
 0x5de   :  { %v990_v31 = vsel %vm982_vm2, %v981_v22, 0.0 }
 0x5df   :  { %v991_v23 = vadd.f32 %v990_v31, %v989_v56  ;;  %v1016_v25 = vrot.slane %v1015_v0, 1 }
 0x5e1   :  { %992 = vadd.xlane.f32.xlu0 %v991_v23  ;;  %v1017_v13 = vadd.f32 %v1016_v25, %v1015_v0 }
 0x66e   :  { %v993_v7 = vpop.xlane.xlu0 %992 }
 0x66f   :  { %v994_v5 = vrot.slane %v993_v7, 4 }
 0x671   :  { %v995_v62 = vadd.f32 %v994_v5, %v993_v7 }
 0x673   :  { %v996_v38 = vrot.slane %v995_v62, 2 }
 0x675   :  { %v997_v8 = vadd.f32 %v996_v38, %v995_v62 }
 0x677   :  { %v998_v57 = vrot.slane %v997_v8, 1 }
 0x679   :  { %v999_v10 = vadd.f32 %v998_v57, %v997_v8 }
 0x67b   :  { %1440 = vpush %v999_v10 }
 0x67c   :  { %1442 = vpush %v1017_v13 }
 0x6ac   :  { %s1441_s3 = spop %1440 }
 0x6ad   :  { %s1443_s19 = spop %1442  ;;  %v1029_v11 = vstv %s1441_s3 }
 0x6ae   :  { %s1019_s8 = smax.f32 %s1518_s5, %s1443_s19  ;;  %v1027_v29 = vstv %s1443_s19 }
 0x6af   :  { %v1020_v27 = vstv %s1019_s8  ;;  %v1028_v30 = vsel %vm1026_vm5, %v1027_v29, 0.0 }
 0x6b0   :  { %1487 = vrcp.f32 %v1020_v27  ;;  %v1030_v33 = vsel %vm1025_vm6, %v1029_v11, %v1028_v30 }
 0x6ba   :  { %v1488_v28 = vpop.eup %1487 }
 0x6bb   :  { %1444 = vpush %v1488_v28 }
 0x6ec   :  { %s1445_s20 = spop %1444 }
 0x6ed   :  { %s1023_s22 = smul.f32 %s1445_s20, %s1441_s3 }
 0x6ef   :  { %v1031_v32 = vstv %s1023_s22 }
 0x6f0   :  { %v1032_v34 = vsel %vm1024_vm7, %v1031_v32, %v1030_v33 }
 0x6f1   :  { %1033 = vst [vmem:[#allocation2] sm:$0x1] %v1032_v34 }
 0x6f2   :  { %1500 = shalt.err (!%p1497_p4)
}
 0x6f3   :  { %s1501_s25 = scalar_lea.hbm %s2255_s13, 16 }
 0x6f4   :  { %p1502_p5 = scmp.ne.s32.totalorder %s2255_s13, %s1501_s25  ;;  %p1505_p6 = scmp.lt.u32.totalorder %s1501_s25, %s2255_s13 }
 0x6f6   :  { %p1507_p7 = pnand %p1505_p6, %p1502_p5 }
 0x6f8   :  { %1510 = shalt.err (!%p1507_p7)
}
 0x6f9   :  { %1043 = dma.vmem_to_hbm [thread:$0]  %s1041_s0, 16, %s2255_s13, [#allocation3]  }
 0x6fa   :  { %1511 = dma.done.wait [#allocation3], 16  }
 0x6fb   :  { %1512 = vsyncadd [#allocation3], 4294967280 }
 0x6fc   :  { %1047 = vsyncpa [#allocation3], 1 }

</bundles_post_ra>
